<compile_context>
chip_gen: v5e
topology: v5e:2x2
jax: 0.10.0
libtpu: 0.0.40
codegen_flags: <defaults>
</compile_context>

<pallas_src>
import functools

import jax
import jax.numpy as jnp
from jax.experimental import pallas as pl
from jax.experimental.pallas import tpu as pltpu

OUT_PAD = 128                    # lane-dense padded width of the final output
FUSED_MAX_N = 1024               # padded node count threshold for the fused path
VMEM_LIMIT = 32 * 1024 * 1024    # budgeted against v7x's 64 MiB physical VMEM


# --------------------------------------------------------------------------- kernels
def encoder_kernel(x_ref, w1_ref, b1_ref, w2_ref, b2_ref, h_ref):
    f32 = jnp.float32
    h = jnp.dot(x_ref[...], w1_ref[...], preferred_element_type=f32) + b1_ref[...]
    h = jnp.maximum(h, 0.0)
    h = jnp.dot(h.astype(jnp.bfloat16), w2_ref[...], preferred_element_type=f32) + b2_ref[...]
    h_ref[...] = jnp.maximum(h, 0.0).astype(h_ref.dtype)


def sage_kernel(a_ref, hn_ref, hs_ref, dinv_ref, wl_ref, wr_ref, b_ref, o_ref,
                acc_ref, *, tk, hn_resident):
    """One SAGEConv layer: relu( (mean_agg(h)) @ Wl + h @ Wr + b ).

    Grid: (row tiles [parallel], contraction tiles [arbitrary]).
    A is int8 in HBM and upcast to bf16 in-kernel; acc_ref is the f32
    un-normalized neighbor sum. hn is either VMEM-resident (full (N,H) block,
    sliced here) or tiled per contraction step.
    """
    k = pl.program_id(1)

    @pl.when(k == 0)
    def _():
        acc_ref[...] = jnp.zeros_like(acc_ref)

    if hn_resident:
        start = pl.multiple_of(k * tk, 512)            # tk is always a multiple of 512
        hn_blk = hn_ref[pl.ds(start, tk), :]
    else:
        hn_blk = hn_ref[...]
    a_blk = a_ref[...].astype(jnp.bfloat16)            # int8 counts -> bf16 (idle VPU slots)
    acc_ref[...] += jnp.dot(a_blk, hn_blk, preferred_element_type=jnp.float32)

    @pl.when(k == pl.num_programs(1) - 1)
    def _():
        agg = (acc_ref[...] * dinv_ref[...]).astype(jnp.bfloat16)   # mean aggregation (f32 scale)
        g = (jnp.dot(agg, wl_ref[...], preferred_element_type=jnp.float32)
             + jnp.dot(hs_ref[...], wr_ref[...], preferred_element_type=jnp.float32)
             + b_ref[...])
        o_ref[...] = jnp.maximum(g, 0.0).astype(o_ref.dtype)


def decoder_kernel(g_ref, wd1_ref, bd1_ref, wd2_ref, bd2_ref, o_ref):
    f32 = jnp.float32
    d = jnp.dot(g_ref[...], wd1_ref[...], preferred_element_type=f32) + bd1_ref[...]
    d = jnp.maximum(d, 0.0)
    d = jnp.dot(d.astype(jnp.bfloat16), wd2_ref[...], preferred_element_type=f32) + bd2_ref[...]
    o_ref[...] = jax.nn.sigmoid(d)                      # lane-dense (TM, 128) store


def fused_kernel(x_ref, a_ref, dinv_ref,
                 w1_ref, b1_ref, w2_ref, b2_ref,
                 wl1_ref, wr1_ref, bl1_ref,
                 wl2_ref, wr2_ref, bl2_ref,
                 wd1_ref, bd1_ref, wd2_ref, bd2_ref, o_ref):
    """Whole forward pass in one kernel (small graphs: A fits VMEM)."""
    f32, bf = jnp.float32, jnp.bfloat16
    # encoder
    h = jnp.dot(x_ref[...], w1_ref[...], preferred_element_type=f32) + b1_ref[...]
    h = jnp.maximum(h, 0.0)
    h = jnp.dot(h.astype(bf), w2_ref[...], preferred_element_type=f32) + b2_ref[...]
    h = jnp.maximum(h, 0.0).astype(bf)

    a = a_ref[...].astype(bf)
    dinv = dinv_ref[...]

    def sage(hcur, wl, wr, b):
        agg = (jnp.dot(a, hcur, preferred_element_type=f32) * dinv).astype(bf)
        g = (jnp.dot(agg, wl, preferred_element_type=f32)
             + jnp.dot(hcur, wr, preferred_element_type=f32) + b)
        return jnp.maximum(g, 0.0).astype(bf)

    g1 = sage(h, wl1_ref[...], wr1_ref[...], bl1_ref[...])
    g2 = sage(g1, wl2_ref[...], wr2_ref[...], bl2_ref[...])

    # decoder
    d = jnp.dot(g2, wd1_ref[...], preferred_element_type=f32) + bd1_ref[...]
    d = jnp.maximum(d, 0.0)
    d = jnp.dot(d.astype(bf), wd2_ref[...], preferred_element_type=f32) + bd2_ref[...]
    o_ref[...] = jax.nn.sigmoid(d)


# --------------------------------------------------------------------------- helpers
def _round_up(n, m):
    return ((n + m - 1) // m) * m


def _plan(n):
    """Return (n_pad, fused, TM, TK). Pads N instead of requiring divisibility."""
    if n <= FUSED_MAX_N:
        n_pad = max(_round_up(n, 128), 128)
        return n_pad, True, n_pad, n_pad
    tm = 512                                  # >= 2 row tiles -> both v7x TCs busy
    n_pad = _round_up(n, tm)
    tk = 512
    for cand in (2048, 1536, 1024):           # largest contraction tile that divides n_pad
        if n_pad % cand == 0:
            tk = cand
            break
    return n_pad, False, tm, tk


def init_params(key, input_dim=32, hidden_dim=24, output_dim=12):
    """Deterministic synthetic parameters. Weights stored pre-transposed as (in, out)."""
    def lin(k, fan_in, fan_out, bias=True):
        kw, kb = jax.random.split(k)
        bound = 1.0 / jnp.sqrt(fan_in)
        w = jax.random.uniform(kw, (fan_in, fan_out), jnp.float32, -bound, bound)
        b = (jax.random.uniform(kb, (1, fan_out), jnp.float32, -bound, bound)
             if bias else None)
        return w, b

    ks = jax.random.split(key, 8)
    p = {}
    p["w1"], p["b1"] = lin(ks[0], input_dim, 64)
    p["w2"], p["b2"] = lin(ks[1], 64, hidden_dim)
    p["wl1"], p["bl1"] = lin(ks[2], hidden_dim, hidden_dim)          # SAGE1 lin_l (bias)
    p["wr1"], _ = lin(ks[3], hidden_dim, hidden_dim, bias=False)     # SAGE1 lin_r
    p["wl2"], p["bl2"] = lin(ks[4], hidden_dim, hidden_dim)          # SAGE2 lin_l
    p["wr2"], _ = lin(ks[5], hidden_dim, hidden_dim, bias=False)     # SAGE2 lin_r
    p["wd1"], p["bd1"] = lin(ks[6], hidden_dim, 24)
    p["wd2"], p["bd2"] = lin(ks[7], 24, output_dim)
    return p


# --------------------------------------------------------------------------- forward
@functools.partial(jax.jit, static_argnames=("num_nodes", "output_dim"))
def ucsage_forward(x, edge_index, params, num_nodes, output_dim=12):
    N = num_nodes
    f32, bf = jnp.float32, jnp.bfloat16
    in_dim = x.shape[1]
    H = params["wl1"].shape[0]
    enc_mid = params["w1"].shape[1]           # 64
    dec_mid = params["wd1"].shape[1]          # 24

    n_pad, fused, TM, TK = _plan(N)

    # --- glue: adjacency built directly at int8 storage dtype; degree from edges (O(E)) ---
    # NOTE: int8 counts assume < 128 duplicate edges per (dst, src) pair.
    src, dst = edge_index[0], edge_index[1]
    a = jnp.zeros((n_pad, n_pad), jnp.int8).at[dst, src].add(1)      # A[i, j] = #edges j->i
    deg = jnp.zeros((n_pad,), f32).at[dst].add(1.0)
    deg_inv = (1.0 / jnp.maximum(deg, 1.0)).reshape(n_pad, 1)
    x_pad = jnp.zeros((n_pad, in_dim), bf).at[:N].set(x.astype(bf))

    # --- parameters: bf16 matmul operands, f32 biases, lane-padded final linear ---
    w1, w2 = params["w1"].astype(bf), params["w2"].astype(bf)
    b1, b2 = params["b1"], params["b2"]
    wl1, wr1, bl1 = params["wl1"].astype(bf), params["wr1"].astype(bf), params["bl1"]
    wl2, wr2, bl2 = params["wl2"].astype(bf), params["wr2"].astype(bf), params["bl2"]
    wd1, bd1 = params["wd1"].astype(bf), params["bd1"]
    wd2p = jnp.zeros((dec_mid, OUT_PAD), f32).at[:, :output_dim].set(params["wd2"]).astype(bf)
    bd2p = jnp.zeros((1, OUT_PAD), f32).at[:, :output_dim].set(params["bd2"])

    if fused:
        # -------- small/medium graph: one kernel, everything resident in VMEM --------
        const = lambda i: (0, 0)
        out_pad = pl.pallas_call(
            fused_kernel,
            out_shape=jax.ShapeDtypeStruct((n_pad, OUT_PAD), f32),
            grid=(1,),
            in_specs=[
                pl.BlockSpec((n_pad, in_dim), const),
                pl.BlockSpec((n_pad, n_pad), const),
                pl.BlockSpec((n_pad, 1), const),
                pl.BlockSpec((in_dim, enc_mid), const),
                pl.BlockSpec((1, enc_mid), const),
                pl.BlockSpec((enc_mid, H), const),
                pl.BlockSpec((1, H), const),
                pl.BlockSpec((H, H), const),
                pl.BlockSpec((H, H), const),
                pl.BlockSpec((1, H), const),
                pl.BlockSpec((H, H), const),
                pl.BlockSpec((H, H), const),
                pl.BlockSpec((1, H), const),
                pl.BlockSpec((H, dec_mid), const),
                pl.BlockSpec((1, dec_mid), const),
                pl.BlockSpec((dec_mid, OUT_PAD), const),
                pl.BlockSpec((1, OUT_PAD), const),
            ],
            out_specs=pl.BlockSpec((n_pad, OUT_PAD), const),
            compiler_params=pltpu.CompilerParams(
                dimension_semantics=("arbitrary",), vmem_limit_bytes=VMEM_LIMIT),
        )(x_pad, a, deg_inv, w1, b1, w2, b2,
          wl1, wr1, bl1, wl2, wr2, bl2, wd1, bd1, wd2p, bd2p)
        return out_pad[:N, :output_dim]

    # -------- large graph: tiled pipeline (encoder -> 2x SAGE -> decoder) --------
    n_row = n_pad // TM
    n_k = n_pad // TK
    cp_rows = pltpu.CompilerParams(dimension_semantics=("parallel",),
                                   vmem_limit_bytes=VMEM_LIMIT)
    cp_sage = pltpu.CompilerParams(dimension_semantics=("parallel", "arbitrary"),
                                   vmem_limit_bytes=VMEM_LIMIT)
    const1 = lambda i: (0, 0)
    const2 = lambda i, k: (0, 0)

    # encoder: row-parallel
    h = pl.pallas_call(
        encoder_kernel,
        out_shape=jax.ShapeDtypeStruct((n_pad, H), bf),
        grid=(n_row,),
        in_specs=[
            pl.BlockSpec((TM, in_dim), lambda i: (i, 0)),
            pl.BlockSpec((in_dim, enc_mid), const1),
            pl.BlockSpec((1, enc_mid), const1),
            pl.BlockSpec((enc_mid, H), const1),
            pl.BlockSpec((1, H), const1),
        ],
        out_specs=pl.BlockSpec((TM, H), lambda i: (i, 0)),
        compiler_params=cp_rows,
    )(x_pad, w1, b1, w2, b2)

    # SAGE layers: int8 A tiles, resident neighbor features when they fit
    hn_resident = (n_pad * H * 2) * 2 <= 8 * 1024 * 1024    # double-buffered (N,H) bf16 budget
    hn_spec = (pl.BlockSpec((n_pad, H), const2) if hn_resident
               else pl.BlockSpec((TK, H), lambda i, k: (k, 0)))
    kern = functools.partial(sage_kernel, tk=TK, hn_resident=hn_resident)
    cost = pl.CostEstimate(
        flops=2 * n_pad * n_pad * H + 4 * n_pad * H * H,
        transcendentals=0,
        bytes_accessed=n_pad * n_pad + 3 * n_pad * H * 2 + n_pad * 4,
    )

    def sage_layer(h_in, wl, wr, b):
        return pl.pallas_call(
            kern,
            out_shape=jax.ShapeDtypeStruct((n_pad, H), bf),
            grid=(n_row, n_k),
            in_specs=[
                pl.BlockSpec((TM, TK), lambda i, k: (i, k)),   # A row-tile x k-tile (int8)
                hn_spec,                                       # neighbor features
                pl.BlockSpec((TM, H), lambda i, k: (i, 0)),    # self features
                pl.BlockSpec((TM, 1), lambda i, k: (i, 0)),    # 1 / in-degree
                pl.BlockSpec((H, H), const2),                  # Wl
                pl.BlockSpec((H, H), const2),                  # Wr
                pl.BlockSpec((1, H), const2),                  # bias (lin_l)
            ],
            out_specs=pl.BlockSpec((TM, H), lambda i, k: (i, 0)),
            scratch_shapes=[pltpu.VMEM((TM, H), jnp.float32)],
            compiler_params=cp_sage,
            cost_estimate=cost,
        )(a, h_in, h_in, deg_inv, wl, wr, b)

    g1 = sage_layer(h, wl1, wr1, bl1)
    g2 = sage_layer(g1, wl2, wr2, bl2)

    # decoder: row-parallel, lane-dense (128-wide) output
    out_pad = pl.pallas_call(
        decoder_kernel,
        out_shape=jax.ShapeDtypeStruct((n_pad, OUT_PAD), f32),
        grid=(n_row,),
        in_specs=[
            pl.BlockSpec((TM, H), lambda i: (i, 0)),
            pl.BlockSpec((H, dec_mid), const1),
            pl.BlockSpec((1, dec_mid), const1),
            pl.BlockSpec((dec_mid, OUT_PAD), const1),
            pl.BlockSpec((1, OUT_PAD), const1),
        ],
        out_specs=pl.BlockSpec((TM, OUT_PAD), lambda i: (i, 0)),
        compiler_params=cp_rows,
    )(g2, wd1, bd1, wd2p, bd2p)

    return out_pad[:N, :output_dim]


# --------------------------------------------------------------------------- reference
def ucsage_reference(x, edge_index, params, num_nodes):
    src, dst = edge_index[0], edge_index[1]
    a = jnp.zeros((num_nodes, num_nodes), jnp.float32).at[dst, src].add(1.0)
    a = a / jnp.maximum(a.sum(axis=1, keepdims=True), 1.0)
    h = jax.nn.relu(x @ params["w1"] + params["b1"])
    h = jax.nn.relu(h @ params["w2"] + params["b2"])
    g = jax.nn.relu((a @ h) @ params["wl1"] + params["bl1"] + h @ params["wr1"])
    g = jax.nn.relu((a @ g) @ params["wl2"] + params["bl2"] + g @ params["wr2"])
    d = jax.nn.relu(g @ params["wd1"] + params["bd1"])
    return jax.nn.sigmoid(d @ params["wd2"] + params["bd2"])


if __name__ == "__main__":
    key = jax.random.PRNGKey(0)
    k_param, k_x1, k_s1, k_d1, k_x2, k_s2, k_d2 = jax.random.split(key, 7)

    INPUT_DIM, HIDDEN_DIM, OUTPUT_DIM = 32, 24, 12
    params = init_params(k_param, INPUT_DIM, HIDDEN_DIM, OUTPUT_DIM)

    def make_graph(kx, ks, kd, n, e):
        xg = jax.random.normal(kx, (n, INPUT_DIM), jnp.float32)
        ei = jnp.stack([
            jax.random.randint(ks, (e,), 0, n),
            jax.random.randint(kd, (e,), 0, n),
        ]).astype(jnp.int32)
        return xg, ei

    # 1) small graph -> fused single-kernel path
    N1, E1 = 16, 40
    x1, ei1 = make_graph(k_x1, k_s1, k_d1, N1, E1)
    out1 = jax.block_until_ready(
        ucsage_forward(x1, ei1, params, num_nodes=N1, output_dim=OUTPUT_DIM))
    assert out1.shape == (N1, OUTPUT_DIM)
    assert bool(jnp.all((out1 >= 0.0) & (out1 <= 1.0)))
    ref1 = ucsage_reference(x1, ei1, params, N1)
    err1 = float(jnp.max(jnp.abs(out1 - ref1)))
    assert err1 < 5e-2, f"fused path: max abs error vs f32 reference too large: {err1}"

    # 2) larger graph -> tiled multi-kernel path (padded to 1536, TM=512, TK=1536)
    N2, E2 = 1100, 4000
    x2, ei2 = make_graph(k_x2, k_s2, k_d2, N2, E2)
    out2 = jax.block_until_ready(
        ucsage_forward(x2, ei2, params, num_nodes=N2, output_dim=OUTPUT_DIM))
    assert out2.shape == (N2, OUTPUT_DIM)
    assert bool(jnp.all((out2 >= 0.0) & (out2 <= 1.0)))
    ref2 = ucsage_reference(x2, ei2, params, N2)
    err2 = float(jnp.max(jnp.abs(out2 - ref2)))
    assert err2 < 5e-2, f"tiled path: max abs error vs f32 reference too large: {err2}"

    print("KERNEL_OK")
</pallas_src>

<mosaic_0001>
module attributes {stable_mosaic.version = 11 : i64} {
  func.func @fused_kernel(%arg0: i32, %arg1: memref<128x32xbf16, #tpu.memory_space<vmem>>, %arg2: memref<128x128xi8, #tpu.memory_space<vmem>>, %arg3: memref<128x1xf32, #tpu.memory_space<vmem>>, %arg4: memref<32x64xbf16, #tpu.memory_space<vmem>>, %arg5: memref<1x64xf32, #tpu.memory_space<vmem>>, %arg6: memref<64x24xbf16, #tpu.memory_space<vmem>>, %arg7: memref<1x24xf32, #tpu.memory_space<vmem>>, %arg8: memref<24x24xbf16, #tpu.memory_space<vmem>>, %arg9: memref<24x24xbf16, #tpu.memory_space<vmem>>, %arg10: memref<1x24xf32, #tpu.memory_space<vmem>>, %arg11: memref<24x24xbf16, #tpu.memory_space<vmem>>, %arg12: memref<24x24xbf16, #tpu.memory_space<vmem>>, %arg13: memref<1x24xf32, #tpu.memory_space<vmem>>, %arg14: memref<24x24xbf16, #tpu.memory_space<vmem>>, %arg15: memref<1x24xf32, #tpu.memory_space<vmem>>, %arg16: memref<24x128xbf16, #tpu.memory_space<vmem>>, %arg17: memref<1x128xf32, #tpu.memory_space<vmem>>, %arg18: memref<128x128xf32, #tpu.memory_space<vmem>>) attributes {dimension_semantics = [#tpu.dimension_semantics<arbitrary>], iteration_bounds = array<i64: 1>, scalar_prefetch = 0 : i64, scratch_operands = 0 : i64, tpu.core_type = #tpu.core_type<tc>, window_params = [{pipeline_mode = #tpu.pipeline_mode<synchronous>, transform_indices = @transform_0, window_bounds = array<i64: 128, 32>}, {pipeline_mode = #tpu.pipeline_mode<synchronous>, transform_indices = @transform_1, window_bounds = array<i64: 128, 128>}, {pipeline_mode = #tpu.pipeline_mode<synchronous>, transform_indices = @transform_2, window_bounds = array<i64: 128, 1>}, {pipeline_mode = #tpu.pipeline_mode<synchronous>, transform_indices = @transform_3, window_bounds = array<i64: 32, 64>}, {pipeline_mode = #tpu.pipeline_mode<synchronous>, transform_indices = @transform_4, window_bounds = array<i64: 1, 64>}, {pipeline_mode = #tpu.pipeline_mode<synchronous>, transform_indices = @transform_5, window_bounds = array<i64: 64, 24>}, {pipeline_mode = #tpu.pipeline_mode<synchronous>, transform_indices = @transform_6, window_bounds = array<i64: 1, 24>}, {pipeline_mode = #tpu.pipeline_mode<synchronous>, transform_indices = @transform_7, window_bounds = array<i64: 24, 24>}, {pipeline_mode = #tpu.pipeline_mode<synchronous>, transform_indices = @transform_8, window_bounds = array<i64: 24, 24>}, {pipeline_mode = #tpu.pipeline_mode<synchronous>, transform_indices = @transform_9, window_bounds = array<i64: 1, 24>}, {pipeline_mode = #tpu.pipeline_mode<synchronous>, transform_indices = @transform_10, window_bounds = array<i64: 24, 24>}, {pipeline_mode = #tpu.pipeline_mode<synchronous>, transform_indices = @transform_11, window_bounds = array<i64: 24, 24>}, {pipeline_mode = #tpu.pipeline_mode<synchronous>, transform_indices = @transform_12, window_bounds = array<i64: 1, 24>}, {pipeline_mode = #tpu.pipeline_mode<synchronous>, transform_indices = @transform_13, window_bounds = array<i64: 24, 24>}, {pipeline_mode = #tpu.pipeline_mode<synchronous>, transform_indices = @transform_14, window_bounds = array<i64: 1, 24>}, {pipeline_mode = #tpu.pipeline_mode<synchronous>, transform_indices = @transform_15, window_bounds = array<i64: 24, 128>}, {pipeline_mode = #tpu.pipeline_mode<synchronous>, transform_indices = @transform_16, window_bounds = array<i64: 1, 128>}, {pipeline_mode = #tpu.pipeline_mode<synchronous>, transform_indices = @transform_17, window_bounds = array<i64: 128, 128>}]} {
    %c0 = arith.constant 0 : index
    %c0_0 = arith.constant 0 : index
    %0 = vector.load %arg1[%c0, %c0_0] : memref<128x32xbf16, #tpu.memory_space<vmem>>, vector<128x32xbf16>
    %c0_1 = arith.constant 0 : index
    %c0_2 = arith.constant 0 : index
    %1 = vector.load %arg4[%c0_1, %c0_2] : memref<32x64xbf16, #tpu.memory_space<vmem>>, vector<32x64xbf16>
    %cst = arith.constant dense<0.000000e+00> : vector<128x64xf32>
    %2 = tpu.matmul %0, %1, %cst {dimension_numbers = #tpu.dot_dimension_numbers<[1], [0], [0], [1], [0, 0, 1, 1], [], []>} : vector<128x32xbf16>, vector<32x64xbf16>, vector<128x64xf32> -> vector<128x64xf32>
    %c0_3 = arith.constant 0 : index
    %c0_4 = arith.constant 0 : index
    %3 = vector.load %arg5[%c0_3, %c0_4] : memref<1x64xf32, #tpu.memory_space<vmem>>, vector<1x64xf32>
    %4 = vector.broadcast %3 : vector<1x64xf32> to vector<128x64xf32>
    %5 = arith.addf %2, %4 : vector<128x64xf32>
    %cst_5 = arith.constant 0.000000e+00 : f32
    %6 = vector.broadcast %cst_5 : f32 to vector<128x64xf32>
    %7 = arith.maximumf %5, %6 : vector<128x64xf32>
    %8 = arith.truncf %7 : vector<128x64xf32> to vector<128x64xbf16>
    %c0_6 = arith.constant 0 : index
    %c0_7 = arith.constant 0 : index
    %9 = vector.load %arg6[%c0_6, %c0_7] : memref<64x24xbf16, #tpu.memory_space<vmem>>, vector<64x24xbf16>
    %cst_8 = arith.constant dense<0.000000e+00> : vector<128x24xf32>
    %10 = tpu.matmul %8, %9, %cst_8 {dimension_numbers = #tpu.dot_dimension_numbers<[1], [0], [0], [1], [0, 0, 1, 1], [], []>} : vector<128x64xbf16>, vector<64x24xbf16>, vector<128x24xf32> -> vector<128x24xf32>
    %c0_9 = arith.constant 0 : index
    %c0_10 = arith.constant 0 : index
    %11 = vector.load %arg7[%c0_9, %c0_10] : memref<1x24xf32, #tpu.memory_space<vmem>>, vector<1x24xf32>
    %12 = vector.broadcast %11 : vector<1x24xf32> to vector<128x24xf32>
    %13 = arith.addf %10, %12 : vector<128x24xf32>
    %cst_11 = arith.constant 0.000000e+00 : f32
    %14 = vector.broadcast %cst_11 : f32 to vector<128x24xf32>
    %15 = arith.maximumf %13, %14 : vector<128x24xf32>
    %16 = arith.truncf %15 : vector<128x24xf32> to vector<128x24xbf16>
    %c0_12 = arith.constant 0 : index
    %c0_13 = arith.constant 0 : index
    %17 = vector.load %arg2[%c0_12, %c0_13] : memref<128x128xi8, #tpu.memory_space<vmem>>, vector<128x128xi8>
    %18 = arith.sitofp %17 : vector<128x128xi8> to vector<128x128xbf16>
    %c0_14 = arith.constant 0 : index
    %c0_15 = arith.constant 0 : index
    %19 = vector.load %arg3[%c0_14, %c0_15] : memref<128x1xf32, #tpu.memory_space<vmem>>, vector<128x1xf32>
    %c0_16 = arith.constant 0 : index
    %c0_17 = arith.constant 0 : index
    %20 = vector.load %arg8[%c0_16, %c0_17] : memref<24x24xbf16, #tpu.memory_space<vmem>>, vector<24x24xbf16>
    %c0_18 = arith.constant 0 : index
    %c0_19 = arith.constant 0 : index
    %21 = vector.load %arg9[%c0_18, %c0_19] : memref<24x24xbf16, #tpu.memory_space<vmem>>, vector<24x24xbf16>
    %c0_20 = arith.constant 0 : index
    %c0_21 = arith.constant 0 : index
    %22 = vector.load %arg10[%c0_20, %c0_21] : memref<1x24xf32, #tpu.memory_space<vmem>>, vector<1x24xf32>
    %cst_22 = arith.constant dense<0.000000e+00> : vector<128x24xf32>
    %23 = tpu.matmul %18, %16, %cst_22 {dimension_numbers = #tpu.dot_dimension_numbers<[1], [0], [0], [1], [0, 0, 1, 1], [], []>} : vector<128x128xbf16>, vector<128x24xbf16>, vector<128x24xf32> -> vector<128x24xf32>
    %24 = vector.broadcast %19 : vector<128x1xf32> to vector<128x24xf32>
    %25 = arith.mulf %23, %24 : vector<128x24xf32>
    %26 = arith.truncf %25 : vector<128x24xf32> to vector<128x24xbf16>
    %cst_23 = arith.constant dense<0.000000e+00> : vector<128x24xf32>
    %27 = tpu.matmul %26, %20, %cst_23 {dimension_numbers = #tpu.dot_dimension_numbers<[1], [0], [0], [1], [0, 0, 1, 1], [], []>} : vector<128x24xbf16>, vector<24x24xbf16>, vector<128x24xf32> -> vector<128x24xf32>
    %cst_24 = arith.constant dense<0.000000e+00> : vector<128x24xf32>
    %28 = tpu.matmul %16, %21, %cst_24 {dimension_numbers = #tpu.dot_dimension_numbers<[1], [0], [0], [1], [0, 0, 1, 1], [], []>} : vector<128x24xbf16>, vector<24x24xbf16>, vector<128x24xf32> -> vector<128x24xf32>
    %29 = arith.addf %27, %28 : vector<128x24xf32>
    %30 = vector.broadcast %22 : vector<1x24xf32> to vector<128x24xf32>
    %31 = arith.addf %29, %30 : vector<128x24xf32>
    %cst_25 = arith.constant 0.000000e+00 : f32
    %32 = vector.broadcast %cst_25 : f32 to vector<128x24xf32>
    %33 = arith.maximumf %31, %32 : vector<128x24xf32>
    %34 = arith.truncf %33 : vector<128x24xf32> to vector<128x24xbf16>
    %c0_26 = arith.constant 0 : index
    %c0_27 = arith.constant 0 : index
    %35 = vector.load %arg11[%c0_26, %c0_27] : memref<24x24xbf16, #tpu.memory_space<vmem>>, vector<24x24xbf16>
    %c0_28 = arith.constant 0 : index
    %c0_29 = arith.constant 0 : index
    %36 = vector.load %arg12[%c0_28, %c0_29] : memref<24x24xbf16, #tpu.memory_space<vmem>>, vector<24x24xbf16>
    %c0_30 = arith.constant 0 : index
    %c0_31 = arith.constant 0 : index
    %37 = vector.load %arg13[%c0_30, %c0_31] : memref<1x24xf32, #tpu.memory_space<vmem>>, vector<1x24xf32>
    %cst_32 = arith.constant dense<0.000000e+00> : vector<128x24xf32>
    %38 = tpu.matmul %18, %34, %cst_32 {dimension_numbers = #tpu.dot_dimension_numbers<[1], [0], [0], [1], [0, 0, 1, 1], [], []>} : vector<128x128xbf16>, vector<128x24xbf16>, vector<128x24xf32> -> vector<128x24xf32>
    %39 = vector.broadcast %19 : vector<128x1xf32> to vector<128x24xf32>
    %40 = arith.mulf %38, %39 : vector<128x24xf32>
    %41 = arith.truncf %40 : vector<128x24xf32> to vector<128x24xbf16>
    %cst_33 = arith.constant dense<0.000000e+00> : vector<128x24xf32>
    %42 = tpu.matmul %41, %35, %cst_33 {dimension_numbers = #tpu.dot_dimension_numbers<[1], [0], [0], [1], [0, 0, 1, 1], [], []>} : vector<128x24xbf16>, vector<24x24xbf16>, vector<128x24xf32> -> vector<128x24xf32>
    %cst_34 = arith.constant dense<0.000000e+00> : vector<128x24xf32>
    %43 = tpu.matmul %34, %36, %cst_34 {dimension_numbers = #tpu.dot_dimension_numbers<[1], [0], [0], [1], [0, 0, 1, 1], [], []>} : vector<128x24xbf16>, vector<24x24xbf16>, vector<128x24xf32> -> vector<128x24xf32>
    %44 = arith.addf %42, %43 : vector<128x24xf32>
    %45 = vector.broadcast %37 : vector<1x24xf32> to vector<128x24xf32>
    %46 = arith.addf %44, %45 : vector<128x24xf32>
    %cst_35 = arith.constant 0.000000e+00 : f32
    %47 = vector.broadcast %cst_35 : f32 to vector<128x24xf32>
    %48 = arith.maximumf %46, %47 : vector<128x24xf32>
    %49 = arith.truncf %48 : vector<128x24xf32> to vector<128x24xbf16>
    %c0_36 = arith.constant 0 : index
    %c0_37 = arith.constant 0 : index
    %50 = vector.load %arg14[%c0_36, %c0_37] : memref<24x24xbf16, #tpu.memory_space<vmem>>, vector<24x24xbf16>
    %cst_38 = arith.constant dense<0.000000e+00> : vector<128x24xf32>
    %51 = tpu.matmul %49, %50, %cst_38 {dimension_numbers = #tpu.dot_dimension_numbers<[1], [0], [0], [1], [0, 0, 1, 1], [], []>} : vector<128x24xbf16>, vector<24x24xbf16>, vector<128x24xf32> -> vector<128x24xf32>
    %c0_39 = arith.constant 0 : index
    %c0_40 = arith.constant 0 : index
    %52 = vector.load %arg15[%c0_39, %c0_40] : memref<1x24xf32, #tpu.memory_space<vmem>>, vector<1x24xf32>
    %53 = vector.broadcast %52 : vector<1x24xf32> to vector<128x24xf32>
    %54 = arith.addf %51, %53 : vector<128x24xf32>
    %cst_41 = arith.constant 0.000000e+00 : f32
    %55 = vector.broadcast %cst_41 : f32 to vector<128x24xf32>
    %56 = arith.maximumf %54, %55 : vector<128x24xf32>
    %57 = arith.truncf %56 : vector<128x24xf32> to vector<128x24xbf16>
    %c0_42 = arith.constant 0 : index
    %c0_43 = arith.constant 0 : index
    %58 = vector.load %arg16[%c0_42, %c0_43] : memref<24x128xbf16, #tpu.memory_space<vmem>>, vector<24x128xbf16>
    %cst_44 = arith.constant dense<0.000000e+00> : vector<128x128xf32>
    %59 = tpu.matmul %57, %58, %cst_44 {dimension_numbers = #tpu.dot_dimension_numbers<[1], [0], [0], [1], [0, 0, 1, 1], [], []>} : vector<128x24xbf16>, vector<24x128xbf16>, vector<128x128xf32> -> vector<128x128xf32>
    %c0_45 = arith.constant 0 : index
    %c0_46 = arith.constant 0 : index
    %60 = vector.load %arg17[%c0_45, %c0_46] : memref<1x128xf32, #tpu.memory_space<vmem>>, vector<1x128xf32>
    %61 = vector.broadcast %60 : vector<1x128xf32> to vector<128x128xf32>
    %62 = arith.addf %59, %61 : vector<128x128xf32>
    %63 = arith.negf %62 : vector<128x128xf32>
    %64 = math.exp %63 : vector<128x128xf32>
    %cst_47 = arith.constant 1.000000e+00 : f32
    %65 = vector.broadcast %cst_47 : f32 to vector<128x128xf32>
    %66 = arith.addf %65, %64 : vector<128x128xf32>
    %67 = arith.divf %65, %66 : vector<128x128xf32>
    %c0_48 = arith.constant 0 : index
    %c0_49 = arith.constant 0 : index
    %68 = vector.load %arg18[%c0_48, %c0_49] : memref<128x128xf32, #tpu.memory_space<vmem>>, vector<128x128xf32>
    tpu.vector_store %arg18[%c0_48, %c0_49], %67 {strides = array<i32>} : memref<128x128xf32, #tpu.memory_space<vmem>>, vector<128x128xf32>,
    return
  }
  func.func @transform_0(%arg0: i32) -> (i32, i32) {
    %c0_i32 = arith.constant 0 : i32
    %c0_i32_0 = arith.constant 0 : i32
    %c0_i32_1 = arith.constant 0 : i32
    return %c0_i32, %c0_i32_0 : i32, i32
  }
  func.func @transform_1(%arg0: i32) -> (i32, i32) {
    %c0_i32 = arith.constant 0 : i32
    %c0_i32_0 = arith.constant 0 : i32
    %c0_i32_1 = arith.constant 0 : i32
    return %c0_i32, %c0_i32_0 : i32, i32
  }
  func.func @transform_2(%arg0: i32) -> (i32, i32) {
    %c0_i32 = arith.constant 0 : i32
    %c0_i32_0 = arith.constant 0 : i32
    %c0_i32_1 = arith.constant 0 : i32
    return %c0_i32, %c0_i32_0 : i32, i32
  }
  func.func @transform_3(%arg0: i32) -> (i32, i32) {
    %c0_i32 = arith.constant 0 : i32
    %c0_i32_0 = arith.constant 0 : i32
    %c0_i32_1 = arith.constant 0 : i32
    return %c0_i32, %c0_i32_0 : i32, i32
  }
  func.func @transform_4(%arg0: i32) -> (i32, i32) {
    %c0_i32 = arith.constant 0 : i32
    %c0_i32_0 = arith.constant 0 : i32
    %c0_i32_1 = arith.constant 0 : i32
    return %c0_i32, %c0_i32_0 : i32, i32
  }
  func.func @transform_5(%arg0: i32) -> (i32, i32) {
    %c0_i32 = arith.constant 0 : i32
    %c0_i32_0 = arith.constant 0 : i32
    %c0_i32_1 = arith.constant 0 : i32
    return %c0_i32, %c0_i32_0 : i32, i32
  }
  func.func @transform_6(%arg0: i32) -> (i32, i32) {
    %c0_i32 = arith.constant 0 : i32
    %c0_i32_0 = arith.constant 0 : i32
    %c0_i32_1 = arith.constant 0 : i32
    return %c0_i32, %c0_i32_0 : i32, i32
  }
  func.func @transform_7(%arg0: i32) -> (i32, i32) {
    %c0_i32 = arith.constant 0 : i32
    %c0_i32_0 = arith.constant 0 : i32
    %c0_i32_1 = arith.constant 0 : i32
    return %c0_i32, %c0_i32_0 : i32, i32
  }
  func.func @transform_8(%arg0: i32) -> (i32, i32) {
    %c0_i32 = arith.constant 0 : i32
    %c0_i32_0 = arith.constant 0 : i32
    %c0_i32_1 = arith.constant 0 : i32
    return %c0_i32, %c0_i32_0 : i32, i32
  }
  func.func @transform_9(%arg0: i32) -> (i32, i32) {
    %c0_i32 = arith.constant 0 : i32
    %c0_i32_0 = arith.constant 0 : i32
    %c0_i32_1 = arith.constant 0 : i32
    return %c0_i32, %c0_i32_0 : i32, i32
  }
  func.func @transform_10(%arg0: i32) -> (i32, i32) {
    %c0_i32 = arith.constant 0 : i32
    %c0_i32_0 = arith.constant 0 : i32
    %c0_i32_1 = arith.constant 0 : i32
    return %c0_i32, %c0_i32_0 : i32, i32
  }
  func.func @transform_11(%arg0: i32) -> (i32, i32) {
    %c0_i32 = arith.constant 0 : i32
    %c0_i32_0 = arith.constant 0 : i32
    %c0_i32_1 = arith.constant 0 : i32
    return %c0_i32, %c0_i32_0 : i32, i32
  }
  func.func @transform_12(%arg0: i32) -> (i32, i32) {
    %c0_i32 = arith.constant 0 : i32
    %c0_i32_0 = arith.constant 0 : i32
    %c0_i32_1 = arith.constant 0 : i32
    return %c0_i32, %c0_i32_0 : i32, i32
  }
  func.func @transform_13(%arg0: i32) -> (i32, i32) {
    %c0_i32 = arith.constant 0 : i32
    %c0_i32_0 = arith.constant 0 : i32
    %c0_i32_1 = arith.constant 0 : i32
    return %c0_i32, %c0_i32_0 : i32, i32
  }
  func.func @transform_14(%arg0: i32) -> (i32, i32) {
    %c0_i32 = arith.constant 0 : i32
    %c0_i32_0 = arith.constant 0 : i32
    %c0_i32_1 = arith.constant 0 : i32
    return %c0_i32, %c0_i32_0 : i32, i32
  }
  func.func @transform_15(%arg0: i32) -> (i32, i32) {
    %c0_i32 = arith.constant 0 : i32
    %c0_i32_0 = arith.constant 0 : i32
    %c0_i32_1 = arith.constant 0 : i32
    return %c0_i32, %c0_i32_0 : i32, i32
  }
  func.func @transform_16(%arg0: i32) -> (i32, i32) {
    %c0_i32 = arith.constant 0 : i32
    %c0_i32_0 = arith.constant 0 : i32
    %c0_i32_1 = arith.constant 0 : i32
    return %c0_i32, %c0_i32_0 : i32, i32
  }
  func.func @transform_17(%arg0: i32) -> (i32, i32) {
    %c0_i32 = arith.constant 0 : i32
    %c0_i32_0 = arith.constant 0 : i32
    %c0_i32_1 = arith.constant 0 : i32
    return %c0_i32, %c0_i32_0 : i32, i32
  }
}

</mosaic_0001>

<bundles_post_ra>
// kernel: ucsage_forward.1
= control target key start
LH: loop header
LB: loop body
LE: loop exit
PB: predicated region body
PF: predicated region fallthrough
CT: control target
= control target key end

     0   :  { %vm133_vm0 = vcmask 261120   ;;  %vm267_vm1 = vcmask 523264   ;;  %vm631_vm2 = vcmask 1043456   ;;  %vm606_vm3 = vcmask 195584   ;;  %s2521_s3 = inlined_call_operand.vmem [shape: bf16[32,64], index: 3, kind: input, shape index: {}]   ;;  %s2522_s4 = inlined_call_operand.vmem [shape: f32[1,64], index: 4, kind: input, shape index: {}]   ;;  %s2523_s0 = inlined_call_operand.vmem [shape: bf16[128,32], index: 0, kind: input, shape index: {}]   ;;  %s2524_s5 = inlined_call_operand.vmem [shape: bf16[64,24], index: 5, kind: input, shape index: {}]   ;;  %s2525_s6 = inlined_call_operand.vmem [shape: f32[1,24], index: 6, kind: input, shape index: {}]   ;;  %s2526_s8 = inlined_call_operand.vmem [shape: bf16[24,24], index: 8, kind: input, shape index: {}]   ;;  %s2527_s2 = inlined_call_operand.vmem [shape: f32[128,1], index: 2, kind: input, shape index: {}]   ;;  %s2528_s1 = inlined_call_operand.vmem [shape: s8[128,128], index: 1, kind: input, shape index: {}]   ;;  %s2529_s7 = inlined_call_operand.vmem [shape: bf16[24,24], index: 7, kind: input, shape index: {}]   ;;  %s2530_s9 = inlined_call_operand.vmem [shape: f32[1,24], index: 9, kind: input, shape index: {}]   ;;  %s2531_s11 = inlined_call_operand.vmem [shape: bf16[24,24], index: 11, kind: input, shape index: {}]   ;;  %s2532_s10 = inlined_call_operand.vmem [shape: bf16[24,24], index: 10, kind: input, shape index: {}]   ;;  %s2533_s12 = inlined_call_operand.vmem [shape: f32[1,24], index: 12, kind: input, shape index: {}]   ;;  %s2534_s13 = inlined_call_operand.vmem [shape: bf16[24,24], index: 13, kind: input, shape index: {}]   ;;  %s2535_s14 = inlined_call_operand.vmem [shape: f32[1,24], index: 14, kind: input, shape index: {}]   ;;  %s2536_s15 = inlined_call_operand.vmem [shape: bf16[24,128], index: 15, kind: input, shape index: {}]   ;;  %s2537_s16 = inlined_call_operand.vmem [shape: f32[1,128], index: 16, kind: input, shape index: {}]   ;;  %s2538_s17 = inlined_call_operand.vmem [shape: f32[128,128], index: 17, kind: output, shape index: {}]  }
   0x1   :  { %2540 = sst [smem:[#allocation2_spill]] %s2521_s3  ;;  %v1797_v2 = vld [vmem:[%s2523_s0] sm:$0xff]  ;;  %v1798_v3 = vld [vmem:[%s2523_s0 + $0x8] sm:$0xff]  ;;  %v1799_v4 = vld [vmem:[%s2523_s0 + $0x10] sm:$0xff] }
   0x2   :  { %2541 = sst [smem:[#allocation3_spill]] %s2522_s4  ;;  %v1802_v5 = vld [vmem:[%s2523_s0 + $0x28] sm:$0xff]  ;;  %v1800_v6 = vld [vmem:[%s2523_s0 + $0x18] sm:$0xff]  ;;  %v1803_v7 = vld [vmem:[%s2523_s0 + $0x30] sm:$0xff] }
   0x3   :  { %s2542_s26 = sld [smem:[#allocation2_spill]]  ;;  %v1801_v8 = vld [vmem:[%s2523_s0 + $0x20] sm:$0xff]  ;;  %v1804_v9 = vld [vmem:[%s2523_s0 + $0x38] sm:$0xff]  ;;  %v1809_v11 = vld [vmem:[%s2524_s5 + $0x10] sm:$0xff] }
   0x4   :  { %v1810_v10 = vld [vmem:[%s2524_s5 + $0x18] sm:$0xff]  ;;  %v1808_v12 = vld [vmem:[%s2524_s5 + $0x8] sm:$0xff]  ;;  %v1807_v13 = vld [vmem:[%s2524_s5] sm:$0xff]  ;;  %s2543_s24 = sld [smem:[#allocation3_spill]] }
   0x9   :  { %v1806_v0 = vld [vmem:[%s2542_s26 + $0x8] sm:$0xff]  ;;  %v1805_v1 = vld [vmem:[%s2542_s26] sm:$0xff] }
   0xa   :  { %164 = vmatpush.bf16.msra.mxu0 %v1806_v0  ;;  %1849 = vmatpush.bf16.msra.mxu1 %v1806_v0  ;;  %v1864_v15 = vld [vmem:[%s2543_s24] ss:$0 sm:$0xff] }
   0xe   :  { %165 = vmatpush.bf16.msra.mxu0 %v1805_v1  ;;  %1850 = vmatpush.bf16.msra.mxu1 %v1805_v1 }
  0x11   :  { %1677 = vmatmul.msk.bf16.vlgmr.msra.gmra.mxu0 %vm133_vm0, %v1797_v2  ;;  %1682 = vmatmul.msk.bf16.vlgmr.msra.gmra.mxu1 %vm133_vm0, %v1802_v5 }
  0x12   :  { %296 = vmatpush.bf16.msrb.mxu1 %v1810_v10  ;;  %v442_v10 = vld [vmem:[%s2526_s8 + $0x8] sm:$0xf] }
  0x16   :  { %297 = vmatpush.bf16.msrb.mxu1 %v1809_v11  ;;  %v602_v11 = vunpack.c.l.b16 %v442_v10 }
  0x1a   :  { %298 = vmatpush.bf16.msrb.mxu1 %v1808_v12  ;;  %v604_v12 = vpack.c.b16 %v602_v11, %v602_v11 }
  0x1e   :  { %299 = vmatpush.bf16.msrb.mxu1 %v1807_v13  ;;  %v2096_v13 = vsel %vm631_vm2, %v604_v12, 0 }
  0x1f   :  { %1851 = vmatpush.bf16.msra.mxu3 %v2096_v13 }
  0x21   :  { %1678 = vmatmul.msk.bf16.gmra.mxu0 %vm133_vm0, %v1798_v3  ;;  %1683 = vmatmul.msk.bf16.gmra.mxu1 %vm133_vm0, %v1803_v7 }
  0x31   :  { %1679 = vmatmul.msk.bf16.gmra.mxu0 %vm133_vm0, %v1799_v4  ;;  %1684 = vmatmul.msk.bf16.gmra.mxu1 %vm133_vm0, %v1804_v9 }
  0x41   :  { %1680 = vmatmul.msk.bf16.gmra.mxu0 %vm133_vm0, %v1800_v6 }
  0x51   :  { %1681 = vmatmul.msk.bf16.gmra.mxu0 %vm133_vm0, %v1801_v8 }
  0x8e   :  { %v167_v14 = vpop.f32.mrf.mxu0  ;;  %v192_v44 = vpop.f32.mrf.mxu1 }
  0x8f   :  { %v168_v16 = vadd.f32 %v1864_v15, %v167_v14  ;;  %v193_v53 = vadd.f32 %v1864_v15, %v192_v44 }
  0x91   :  { %v207_v19 = vmax.f32 %v168_v16, 0.0  ;;  %v217_v55 = vmax.f32 %v193_v53, 0.0 }
  0x96   :  { %v169_v17 = vpop.f32.mrf.mxu0  ;;  %v194_v48 = vpop.f32.mrf.mxu1 }
  0x97   :  { %v170_v18 = vadd.f32 %v1864_v15, %v169_v17  ;;  %v195_v54 = vadd.f32 %v1864_v15, %v194_v48  ;;  %v422_v48 = vld [vmem:[%s2527_s2 + $0x8] sm:$0xff] }
  0x99   :  { %v208_v20 = vmax.f32 %v170_v18, 0.0  ;;  %v218_v56 = vmax.f32 %v195_v54, 0.0 }
  0x9b   :  { %v223_v21 = vpack.c.bf16 %v208_v20, %v207_v19  ;;  %v228_v57 = vpack.c.bf16 %v218_v56, %v217_v55  ;;  %v2114_v19 = vld [vmem:[%s2525_s6] ss:$0 sm:$0xff] }
  0x9d   :  { %1701 = vmatmul.msk.bf16.vlgmr.msrb.gmra.mxu1 %vm267_vm1, %v223_v21 }
  0x9e   :  { %v172_v22 = vpop.f32.mrf.mxu0  ;;  %v197_v52 = vpop.f32.mrf.mxu1 }
  0x9f   :  { %v173_v23 = vadd.f32 %v1864_v15, %v172_v22  ;;  %v198_v59 = vadd.f32 %v1864_v15, %v197_v52 }
  0xa1   :  { %v209_v26 = vmax.f32 %v173_v23, 0.0  ;;  %v219_v62 = vmax.f32 %v198_v59, 0.0  ;;  %v430_v59 = vld [vmem:[%s2527_s2 + $0x48] sm:$0xff] }
  0xa6   :  { %v174_v24 = vpop.f32.mrf.mxu0  ;;  %v199_v58 = vpop.f32.mrf.mxu1 }
  0xa7   :  { %v175_v25 = vadd.f32 %v1864_v15, %v174_v24  ;;  %v200_v60 = vadd.f32 %v1864_v15, %v199_v58  ;;  %v423_v58 = vld [vmem:[%s2527_s2 + $0x10] sm:$0xff] }
  0xa9   :  { %v210_v27 = vmax.f32 %v175_v25, 0.0  ;;  %v220_v63 = vmax.f32 %v200_v60, 0.0  ;;  %v424_v60 = vld [vmem:[%s2527_s2 + $0x18] sm:$0xff] }
  0xab   :  { %v224_v28 = vpack.c.bf16 %v210_v27, %v209_v26  ;;  %v229_v0 = vpack.c.bf16 %v220_v63, %v219_v62 }
  0xad   :  { %1702 = vmatmul.msk.bf16.gmra.mxu1 %vm267_vm1, %v224_v28 }
  0xae   :  { %v177_v29 = vpop.f32.mrf.mxu0  ;;  %v202_v61 = vpop.f32.mrf.mxu1 }
  0xaf   :  { %v178_v30 = vadd.f32 %v1864_v15, %v177_v29  ;;  %v203_v2 = vadd.f32 %v1864_v15, %v202_v61  ;;  %v433_v61 = vld [vmem:[%s2527_s2 + $0x60] sm:$0xff] }
  0xb1   :  { %v211_v33 = vmax.f32 %v178_v30, 0.0  ;;  %v221_v4 = vmax.f32 %v203_v2, 0.0  ;;  %v428_v2 = vld [vmem:[%s2527_s2 + $0x38] sm:$0xff] }
  0xb6   :  { %v179_v31 = vpop.f32.mrf.mxu0  ;;  %v204_v1 = vpop.f32.mrf.mxu1 }
  0xb7   :  { %v180_v32 = vadd.f32 %v1864_v15, %v179_v31  ;;  %v205_v3 = vadd.f32 %v1864_v15, %v204_v1 }
  0xb9   :  { %v212_v34 = vmax.f32 %v180_v32, 0.0  ;;  %v222_v5 = vmax.f32 %v205_v3, 0.0  ;;  %v436_v3 = vld [vmem:[%s2527_s2 + $0x78] sm:$0xff] }
  0xbb   :  { %v225_v35 = vpack.c.bf16 %v212_v34, %v211_v33  ;;  %v230_v6 = vpack.c.bf16 %v222_v5, %v221_v4 }
  0xbd   :  { %1703 = vmatmul.msk.bf16.gmra.mxu1 %vm267_vm1, %v225_v35 }
  0xbe   :  { %v182_v36 = vpop.f32.mrf.mxu0 }
  0xbf   :  { %v183_v37 = vadd.f32 %v1864_v15, %v182_v36 }
  0xc1   :  { %v213_v40 = vmax.f32 %v183_v37, 0.0 }
  0xc6   :  { %v184_v38 = vpop.f32.mrf.mxu0 }
  0xc7   :  { %v185_v39 = vadd.f32 %v1864_v15, %v184_v38 }
  0xc9   :  { %v214_v41 = vmax.f32 %v185_v39, 0.0 }
  0xcb   :  { %v226_v42 = vpack.c.bf16 %v214_v41, %v213_v40  ;;  %v421_v41 = vld [vmem:[%s2527_s2] sm:$0xff] }
  0xcd   :  { %1704 = vmatmul.msk.bf16.gmra.mxu1 %vm267_vm1, %v226_v42  ;;  %v1934_v42 = vmov 0  }
  0xce   :  { %v187_v43 = vpop.f32.mrf.mxu0  ;;  %1861 = vset.pattern.permute.xlu0 %v1934_v42  ;;  %1862 = vset.pattern.permute.xlu1 %v1934_v42 }
  0xcf   :  { %v188_v45 = vadd.f32 %v1864_v15, %v187_v43  ;;  %495 = vperm.xlu0 %1861, %v421_v41   ;;  %1863 = vset.pattern.permute.xlu2 %v1934_v42 }
  0xd0   :  { %505 = vperm.xlu1 %1862, %v423_v58  }
  0xd1   :  { %v215_v49 = vmax.f32 %v188_v45, 0.0 }
  0xd6   :  { %v189_v46 = vpop.f32.mrf.mxu0 }
  0xd7   :  { %v190_v47 = vadd.f32 %v1864_v15, %v189_v46  ;;  %v2104_v15 = vld [vmem:[%s2526_s8] sm:$0xff]  ;;  %500 = vperm.xlu0 %1861, %v422_v48  }
  0xd8   :  { %1852 = vmatpush.bf16.msra.mxu3 %v2104_v15  ;;  %510 = vperm.xlu1 %1862, %v424_v60  }
  0xd9   :  { %v216_v50 = vmax.f32 %v190_v47, 0.0 }
  0xdb   :  { %v227_v51 = vpack.c.bf16 %v216_v50, %v215_v49 }
  0xdd   :  { %1705 = vmatmul.msk.bf16.gmra.mxu1 %vm267_vm1, %v227_v51  ;;  %v427_v51 = vld [vmem:[%s2527_s2 + $0x30] sm:$0xff] }
  0xdf   :  { %525 = vperm.xlu0 %1861, %v427_v51  }
  0xe0   :  { %530 = vperm.xlu1 %1862, %v428_v2  }
  0xe7   :  { %540 = vperm.xlu0 %1861, %v430_v59  }
  0xed   :  { %1706 = vmatmul.msk.bf16.gmra.mxu1 %vm267_vm1, %v228_v57 }
  0xef   :  { %555 = vperm.xlu0 %1861, %v433_v61  }
  0xf7   :  { %570 = vperm.xlu0 %1861, %v436_v3  }
  0xfd   :  { %1707 = vmatmul.msk.bf16.gmra.mxu1 %vm267_vm1, %v229_v0 }
 0x10d   :  { %1708 = vmatmul.msk.bf16.gmra.mxu1 %vm267_vm1, %v230_v6  ;;  %v1818_v6 = vld [vmem:[%s2528_s1] sm:$0xff]  }
 0x11a   :  { %v2086_v7 = vpop.f32.mrf.mxu1 }
 0x122   :  { %v2088_v8 = vpop.f32.mrf.mxu1 }
 0x123   :  { %v304_v10 = vadd.f32 %v2114_v19, %v2088_v8 }
 0x12a   :  { %v2090_v9 = vpop.f32.mrf.mxu1 }
 0x12b   :  { %v307_v4 = vadd.f32 %v2114_v19, %v2090_v9  ;;  %v302_v9 = vadd.f32 %v2114_v19, %v2086_v7  ;;  %v434_v7 = vld [vmem:[%s2527_s2 + $0x68] sm:$0xff] }
 0x132   :  { %v2098_v14 = vpop.f32.mrf.mxu1 }
 0x133   :  { %v309_v0 = vadd.f32 %v2114_v19, %v2098_v14  ;;  %v1819_v14 = vunpack.c.0.s8 %v1818_v6 }
 0x135   :  { %v344_v11 = vmax.f32 %v309_v0, 0.0 }
 0x13a   :  { %v2107_v16 = vpop.f32.mrf.mxu1 }
 0x13b   :  { %v312_v63 = vadd.f32 %v2114_v19, %v2107_v16  ;;  %v1820_v16 = vunpack.c.1.s8 %v1818_v6 }
 0x13d   :  { %v345_v5 = vmax.f32 %v312_v63, 0.0  ;;  %v398_v8 = vcvt.s32.f32 %v1820_v16 }
 0x142   :  { %v2109_v17 = vpop.f32.mrf.mxu1 }
 0x143   :  { %v314_v62 = vadd.f32 %v2114_v19, %v2109_v17  ;;  %v343_v17 = vmax.f32 %v307_v4, 0.0 }
 0x145   :  { %v346_v1 = vmax.f32 %v314_v62, 0.0 }
 0x147   :  { %v2175_v12 = vpack.c.bf16 %v346_v1, %v345_v5  ;;  %v1811_v5 = vld [vmem:[%s2529_s7] sm:$0xff] }
 0x14a   :  { %v316_v18 = vpop.f32.mrf.mxu1 }
 0x14b   :  { %v317_v20 = vadd.f32 %v2114_v19, %v316_v18  ;;  %v342_v18 = vmax.f32 %v304_v10, 0.0  ;;  %v2251_v10 = vpop.permute.xlu0 %495 }
 0x14d   :  { %v347_v23 = vmax.f32 %v317_v20, 0.0  ;;  %v2180_v20 = vpack.c.bf16 %v344_v11, %v343_v17 }
 0x152   :  { %v318_v21 = vpop.f32.mrf.mxu1 }
 0x153   :  { %v319_v22 = vadd.f32 %v2114_v19, %v318_v21  ;;  %v431_v21 = vld [vmem:[%s2527_s2 + $0x50] sm:$0xff] }
 0x154   :  { %545 = vperm.xlu1 %1862, %v431_v21   ;;  %v2260_v21 = vpop.permute.xlu1 %505 }
 0x155   :  { %v348_v24 = vmax.f32 %v319_v22, 0.0  ;;  %v397_v22 = vcvt.s32.f32 %v1819_v14  ;;  %v2253_v14 = vpop.permute.xlu0 %500 }
 0x157   :  { %v2118_v25 = vpack.c.bf16 %v348_v24, %v347_v23  ;;  %v341_v23 = vmax.f32 %v302_v9, 0.0 }
 0x159   :  { %1716 = vmatmul.msk.bf16.vlgmr.msra.gmra.mxu3 %vm606_vm3, %v2118_v25  ;;  %v2186_v24 = vpack.c.bf16 %v342_v18, %v341_v23 }
 0x15a   :  { %v321_v26 = vpop.f32.mrf.mxu1 }
 0x15b   :  { %v322_v27 = vadd.f32 %v2114_v19, %v321_v26  ;;  %v1824_v26 = vunpack.c.3.s8 %v1818_v6 }
 0x15c   :  { %560 = vperm.xlu1 %1862, %v434_v7  }
 0x15d   :  { %v349_v30 = vmax.f32 %v322_v27, 0.0  ;;  %v425_v27 = vld [vmem:[%s2527_s2 + $0x20] sm:$0xff] }
 0x15e   :  { %515 = vperm.xlu2 %1863, %v425_v27  }
 0x162   :  { %v323_v28 = vpop.f32.mrf.mxu1 }
 0x163   :  { %v324_v29 = vadd.f32 %v2114_v19, %v323_v28 }
 0x165   :  { %v350_v31 = vmax.f32 %v324_v29, 0.0  ;;  %v400_v29 = vcvt.s32.f32 %v1824_v26 }
 0x167   :  { %v361_v32 = vpack.c.bf16 %v350_v31, %v349_v30 }
 0x169   :  { %1717 = vmatmul.msk.bf16.gmra.mxu3 %vm606_vm3, %v361_v32 }
 0x16a   :  { %v326_v33 = vpop.f32.mrf.mxu1 }
 0x16b   :  { %v327_v34 = vadd.f32 %v2114_v19, %v326_v33  ;;  %v429_v33 = vld [vmem:[%s2527_s2 + $0x40] sm:$0xff] }
 0x16d   :  { %v351_v37 = vmax.f32 %v327_v34, 0.0 }
 0x172   :  { %v328_v35 = vpop.f32.mrf.mxu1 }
 0x173   :  { %v329_v36 = vadd.f32 %v2114_v19, %v328_v35 }
 0x175   :  { %v352_v38 = vmax.f32 %v329_v36, 0.0 }
 0x177   :  { %v362_v39 = vpack.c.bf16 %v352_v38, %v351_v37  ;;  %v432_v37 = vld [vmem:[%s2527_s2 + $0x58] sm:$0xff] }
 0x179   :  { %1718 = vmatmul.msk.bf16.gmra.mxu3 %vm606_vm3, %v362_v39 }
 0x17a   :  { %v331_v40 = vpop.f32.mrf.mxu1 }
 0x17b   :  { %v332_v43 = vadd.f32 %v2114_v19, %v331_v40  ;;  %v435_v40 = vld [vmem:[%s2527_s2 + $0x70] sm:$0xff] }
 0x17d   :  { %v353_v46 = vmax.f32 %v332_v43, 0.0 }
 0x182   :  { %v333_v44 = vpop.f32.mrf.mxu1 }
 0x183   :  { %v334_v45 = vadd.f32 %v2114_v19, %v333_v44  ;;  %v1856_v44 = vld [vmem:[%s2528_s1 + $0x10] sm:$0xff]  }
 0x184   :  { %v1840_v51 = vunpack.c.3.s8 %v1856_v44 }
 0x185   :  { %v354_v47 = vmax.f32 %v334_v45, 0.0  ;;  %v1835_v45 = vunpack.c.0.s8 %v1856_v44 }
 0x187   :  { %v363_v49 = vpack.c.bf16 %v354_v47, %v353_v46  ;;  %v1836_v46 = vunpack.c.1.s8 %v1856_v44  ;;  %v405_v47 = vcvt.s32.f32 %v1835_v45 }
 0x189   :  { %1719 = vmatmul.msk.bf16.gmra.mxu3 %vm606_vm3, %v363_v49  ;;  %v406_v48 = vcvt.s32.f32 %v1836_v46 }
 0x18a   :  { %v336_v50 = vpop.f32.mrf.mxu1 }
 0x18b   :  { %v337_v52 = vadd.f32 %v2114_v19, %v336_v50  ;;  %v1839_v50 = vunpack.c.2.s8 %v1856_v44 }
 0x18d   :  { %v355_v55 = vmax.f32 %v337_v52, 0.0  ;;  %v407_v52 = vcvt.s32.f32 %v1839_v50 }
 0x192   :  { %v338_v53 = vpop.f32.mrf.mxu1 }
 0x193   :  { %v339_v54 = vadd.f32 %v2114_v19, %v338_v53  ;;  %v1823_v19 = vunpack.c.2.s8 %v1818_v6  ;;  %v408_v53 = vcvt.s32.f32 %v1840_v51 }
 0x195   :  { %v356_v56 = vmax.f32 %v339_v54, 0.0  ;;  %v399_v28 = vcvt.s32.f32 %v1823_v19  ;;  %v2230_v54 = vpack.c.bf16 %v408_v53, %v407_v52 }
 0x197   :  { %v364_v57 = vpack.c.bf16 %v356_v56, %v355_v55  ;;  %v2200_v30 = vpack.c.bf16 %v400_v29, %v399_v28  ;;  %v439_v55 = vld [vmem:[%s2529_s7 + $0x8] sm:$0xf]  ;;  %v1858_v56 = vld [vmem:[%s2528_s1 + $0x18] sm:$0xff]  }
 0x198   :  { %v1843_v59 = vunpack.c.0.s8 %v1858_v56  ;;  %v1844_v60 = vunpack.c.1.s8 %v1858_v56  ;;  %v1847_v1 = vunpack.c.2.s8 %v1858_v56  ;;  %v1848_v2 = vunpack.c.3.s8 %v1858_v56 }
 0x199   :  { %444 = vmatpush.bf16.msra.mxu2 %v364_v57  ;;  %1720 = vmatmul.msk.bf16.gmra.mxu3 %vm606_vm3, %v364_v57  ;;  %v689_v57 = vunpack.c.l.b16 %v439_v55 }
 0x19a   :  { %v409_v62 = vcvt.s32.f32 %v1843_v59  ;;  %v410_v63 = vcvt.s32.f32 %v1844_v60  ;;  %v411_v3 = vcvt.s32.f32 %v1847_v1  ;;  %v412_v4 = vcvt.s32.f32 %v1848_v2 }
 0x19b   :  { %v691_v58 = vpack.c.b16 %v689_v57, %v689_v57 }
 0x19c   :  { %v2240_v0 = vpack.c.bf16 %v410_v63, %v409_v62  ;;  %v2246_v6 = vpack.c.bf16 %v412_v4, %v411_v3  ;;  %v817_v62 = vld [vmem:[%s2531_s11 + $0x8] sm:$0xf]  ;;  %v1814_v4 = vld [vmem:[%s2531_s11] sm:$0xff] }
 0x19d   :  { %445 = vmatpush.bf16.msra.mxu2 %v363_v49  ;;  %v2227_v49 = vpack.c.bf16 %v406_v48, %v405_v47  ;;  %v718_v61 = vsel %vm631_vm2, %v691_v58, 0  ;;  %v897_v63 = vunpack.c.l.b16 %v817_v62 }
 0x19e   :  { %726 = vmatpush.bf16.msrb.mxu0 %v718_v61 }
 0x19f   :  { %v899_v2 = vpack.c.b16 %v897_v63, %v897_v63 }
 0x1a1   :  { %446 = vmatpush.bf16.msra.mxu2 %v362_v39  ;;  %v926_v3 = vsel %vm631_vm2, %v899_v2, 0 }
 0x1a2   :  { %727 = vmatpush.bf16.msrb.mxu0 %v1811_v5  ;;  %934 = vmatpush.bf16.msra.mxu1 %v926_v3 }
 0x1a5   :  { %447 = vmatpush.bf16.msra.mxu2 %v361_v32 }
 0x1a6   :  { %935 = vmatpush.bf16.msra.mxu1 %v1814_v4 }
 0x1a9   :  { %448 = vmatpush.bf16.msra.mxu2 %v2118_v25  ;;  %v2188_v25 = vpack.c.bf16 %v398_v8, %v397_v22  ;;  %v2262_v8 = vpop.permute.xlu1 %510 }
 0x1ad   :  { %449 = vmatpush.bf16.msra.mxu2 %v2175_v12 }
 0x1b1   :  { %450 = vmatpush.bf16.msra.mxu2 %v2180_v20 }
 0x1b5   :  { %451 = vmatpush.bf16.msra.mxu2 %v2186_v24 }
 0x1b8   :  { %452 = vmatmul.bf16.vlgmr.msra.gmra.mxu2 %v2188_v25  ;;  %v2269_v26 = vpop.permute.xlu2 %515 }
 0x1b9   :  { %641 = vmatpush.bf16.msrb.mxu2 %v2096_v13  ;;  %v426_v13 = vld [vmem:[%s2527_s2 + $0x28] sm:$0xff] }
 0x1ba   :  { %520 = vperm.xlu2 %1863, %v426_v13  }
 0x1bd   :  { %642 = vmatpush.bf16.msrb.mxu2 %v2104_v15  ;;  %v1854_v15 = vld [vmem:[%s2528_s1 + $0x8] sm:$0xff]  }
 0x1be   :  { %v1827_v31 = vunpack.c.0.s8 %v1854_v15  ;;  %v1828_v32 = vunpack.c.1.s8 %v1854_v15  ;;  %v1831_v38 = vunpack.c.2.s8 %v1854_v15  ;;  %v1832_v39 = vunpack.c.3.s8 %v1854_v15 }
 0x1c0   :  { %v401_v34 = vcvt.s32.f32 %v1827_v31  ;;  %v402_v35 = vcvt.s32.f32 %v1828_v32  ;;  %v403_v41 = vcvt.s32.f32 %v1831_v38  ;;  %v404_v42 = vcvt.s32.f32 %v1832_v39  ;;  %v2276_v32 = vpop.permute.xlu0 %525 }
 0x1c2   :  { %535 = vperm.xlu2 %1863, %v429_v33   ;;  %v2212_v36 = vpack.c.bf16 %v402_v35, %v401_v34  ;;  %v2221_v43 = vpack.c.bf16 %v404_v42, %v403_v41  ;;  %v2278_v33 = vpop.permute.xlu1 %530 }
 0x1c8   :  { %457 = vmatmul.bf16.gmra.mxu2 %v2200_v30  ;;  %v2283_v39 = vpop.permute.xlu0 %540 }
 0x1ca   :  { %550 = vperm.xlu2 %1863, %v432_v37   ;;  %v2290_v47 = vpop.permute.xlu1 %545 }
 0x1d0   :  { %v2297_v56 = vpop.permute.xlu0 %555 }
 0x1d2   :  { %565 = vperm.xlu2 %1863, %v435_v40   ;;  %v2299_v57 = vpop.permute.xlu1 %560 }
 0x1d8   :  { %462 = vmatmul.bf16.gmra.mxu2 %v2212_v36  ;;  %v2311_v5 = vpop.permute.xlu0 %570 }
 0x1e8   :  { %467 = vmatmul.bf16.gmra.mxu2 %v2221_v43 }
 0x1f8   :  { %472 = vmatmul.bf16.gmra.mxu2 %v2227_v49 }
 0x208   :  { %477 = vmatmul.bf16.gmra.mxu2 %v2230_v54 }
 0x214   :  { %v2271_v27 = vpop.permute.xlu2 %520 }
 0x218   :  { %482 = vmatmul.bf16.gmra.mxu2 %v2240_v0 }
 0x21c   :  { %v2285_v40 = vpop.permute.xlu2 %535 }
 0x224   :  { %v2292_v48 = vpop.permute.xlu2 %550 }
 0x228   :  { %487 = vmatmul.bf16.gmra.mxu2 %v2246_v6 }
 0x238   :  { %1713 = vmatmul.msk.bf16.vlgmr.msrb.gmra.mxu2 %vm606_vm3, %v2186_v24 }
 0x23b   :  { %v453_v11 = vpop.f32.mrf.mxu2 }
 0x23c   :  { %v573_v9 = vmul.f32 %v2251_v10, %v453_v11  ;;  %v2313_v11 = vpop.permute.xlu2 %565 }
 0x243   :  { %v455_v16 = vpop.f32.mrf.mxu2 }
 0x244   :  { %v574_v17 = vmul.f32 %v2253_v14, %v455_v16 }
 0x246   :  { %v589_v18 = vpack.c.bf16 %v574_v17, %v573_v9 }
 0x248   :  { %1714 = vmatmul.msk.bf16.gmra.mxu2 %vm606_vm3, %v2180_v20  ;;  %1725 = vmatmul.msk.bf16.vlgmr.msrb.gmra.mxu0 %vm606_vm3, %v589_v18 }
 0x24b   :  { %v458_v22 = vpop.f32.mrf.mxu2 }
 0x24c   :  { %v575_v24 = vmul.f32 %v2260_v21, %v458_v22 }
 0x253   :  { %v460_v23 = vpop.f32.mrf.mxu2 }
 0x254   :  { %v576_v7 = vmul.f32 %v2262_v8, %v460_v23 }
 0x256   :  { %v590_v19 = vpack.c.bf16 %v576_v7, %v575_v24 }
 0x258   :  { %1715 = vmatmul.msk.bf16.gmra.mxu2 %vm606_vm3, %v2175_v12  ;;  %1726 = vmatmul.msk.bf16.gmra.mxu0 %vm606_vm3, %v590_v19  ;;  %v2321_v19 = vld [vmem:[%s2530_s9] ss:$0 sm:$0xff] }
 0x25b   :  { %v463_v20 = vpop.f32.mrf.mxu2 }
 0x25c   :  { %v577_v29 = vmul.f32 %v2269_v26, %v463_v20 }
 0x263   :  { %v465_v28 = vpop.f32.mrf.mxu2 }
 0x264   :  { %v578_v13 = vmul.f32 %v2271_v27, %v465_v28 }
 0x266   :  { %v591_v15 = vpack.c.bf16 %v578_v13, %v577_v29 }
 0x268   :  { %1727 = vmatmul.msk.bf16.gmra.mxu0 %vm606_vm3, %v591_v15 }
 0x26b   :  { %v468_v31 = vpop.f32.mrf.mxu2 }
 0x26c   :  { %v579_v34 = vmul.f32 %v2276_v32, %v468_v31 }
 0x273   :  { %v470_v12 = vpop.f32.mrf.mxu2 }
 0x274   :  { %v580_v35 = vmul.f32 %v2278_v33, %v470_v12 }
 0x276   :  { %v592_v37 = vpack.c.bf16 %v580_v35, %v579_v34 }
 0x278   :  { %1728 = vmatmul.msk.bf16.gmra.mxu0 %vm606_vm3, %v592_v37 }
 0x27b   :  { %v473_v38 = vpop.f32.mrf.mxu2 }
 0x27c   :  { %v581_v42 = vmul.f32 %v2285_v40, %v473_v38 }
 0x283   :  { %v475_v41 = vpop.f32.mrf.mxu2 }
 0x284   :  { %v582_v44 = vmul.f32 %v2283_v39, %v475_v41 }
 0x286   :  { %v593_v45 = vpack.c.bf16 %v582_v44, %v581_v42 }
 0x288   :  { %1729 = vmatmul.msk.bf16.gmra.mxu0 %vm606_vm3, %v593_v45 }
 0x28b   :  { %v478_v46 = vpop.f32.mrf.mxu2 }
 0x28c   :  { %v583_v51 = vmul.f32 %v2290_v47, %v478_v46  ;;  %v659_v46 = vpop.f32.mrf.mxu3 }
 0x293   :  { %v480_v50 = vpop.f32.mrf.mxu2 }
 0x294   :  { %v584_v52 = vmul.f32 %v2292_v48, %v480_v50 }
 0x296   :  { %v594_v53 = vpack.c.bf16 %v584_v52, %v583_v51 }
 0x298   :  { %1730 = vmatmul.msk.bf16.gmra.mxu0 %vm606_vm3, %v594_v53 }
 0x29b   :  { %v483_v55 = vpop.f32.mrf.mxu2 }
 0x29c   :  { %v585_v59 = vmul.f32 %v2297_v56, %v483_v55 }
 0x2a3   :  { %v485_v58 = vpop.f32.mrf.mxu2 }
 0x2a4   :  { %v586_v60 = vmul.f32 %v2299_v57, %v485_v58 }
 0x2a6   :  { %v595_v61 = vpack.c.bf16 %v586_v60, %v585_v59  ;;  %v661_v59 = vpop.f32.mrf.mxu3 }
 0x2a8   :  { %1731 = vmatmul.msk.bf16.gmra.mxu0 %vm606_vm3, %v595_v61 }
 0x2ab   :  { %v488_v1 = vpop.f32.mrf.mxu2 }
 0x2ac   :  { %v587_v9 = vmul.f32 %v2313_v11, %v488_v1 }
 0x2b3   :  { %v490_v16 = vpop.f32.mrf.mxu2 }
 0x2b4   :  { %v588_v17 = vmul.f32 %v2311_v5, %v490_v16 }
 0x2b6   :  { %v596_v18 = vpack.c.bf16 %v588_v17, %v587_v9  ;;  %v664_v9 = vpop.f32.mrf.mxu3 }
 0x2b8   :  { %1732 = vmatmul.msk.bf16.gmra.mxu0 %vm606_vm3, %v596_v18 }
 0x2bb   :  { %v644_v22 = vpop.f32.mrf.mxu2 }
 0x2c3   :  { %v646_v23 = vpop.f32.mrf.mxu2 }
 0x2c5   :  { %v729_v24 = vpop.f32.mrf.mxu0 }
 0x2c6   :  { %v730_v7 = vadd.f32 %v729_v24, %v644_v22 }
 0x2c8   :  { %v772_v28 = vadd.f32 %v2321_v19, %v730_v7  ;;  %v666_v7 = vpop.f32.mrf.mxu3 }
 0x2ca   :  { %v788_v31 = vmax.f32 %v772_v28, 0.0 }
 0x2cb   :  { %v649_v13 = vpop.f32.mrf.mxu2 }
 0x2cd   :  { %v731_v20 = vpop.f32.mrf.mxu0 }
 0x2ce   :  { %v732_v29 = vadd.f32 %v731_v20, %v646_v23 }
 0x2d0   :  { %v773_v15 = vadd.f32 %v2321_v19, %v732_v29 }
 0x2d2   :  { %v789_v12 = vmax.f32 %v773_v15, 0.0 }
 0x2d3   :  { %v651_v37 = vpop.f32.mrf.mxu2 }
 0x2d4   :  { %v2325_v34 = vpack.c.bf16 %v789_v12, %v788_v31  ;;  %v669_v31 = vpop.f32.mrf.mxu3 }
 0x2d5   :  { %v734_v35 = vpop.f32.mrf.mxu0 }
 0x2d6   :  { %1737 = vmatmul.msk.bf16.vlgmr.msra.gmra.mxu1 %vm606_vm3, %v2325_v34  ;;  %v735_v38 = vadd.f32 %v734_v35, %v649_v13 }
 0x2d8   :  { %v774_v42 = vadd.f32 %v2321_v19, %v735_v38 }
 0x2da   :  { %v790_v50 = vmax.f32 %v774_v42, 0.0 }
 0x2db   :  { %v654_v52 = vpop.f32.mrf.mxu2 }
 0x2dd   :  { %v736_v41 = vpop.f32.mrf.mxu0 }
 0x2de   :  { %v737_v44 = vadd.f32 %v736_v41, %v651_v37 }
 0x2e0   :  { %v775_v45 = vadd.f32 %v2321_v19, %v737_v44 }
 0x2e2   :  { %v791_v51 = vmax.f32 %v775_v45, 0.0  ;;  %v671_v45 = vpop.f32.mrf.mxu3 }
 0x2e3   :  { %v656_v60 = vpop.f32.mrf.mxu2 }
 0x2e4   :  { %v2331_v53 = vpack.c.bf16 %v791_v51, %v790_v50 }
 0x2e5   :  { %v739_v55 = vpop.f32.mrf.mxu0 }
 0x2e6   :  { %1738 = vmatmul.msk.bf16.gmra.mxu1 %vm606_vm3, %v2331_v53  ;;  %v740_v58 = vadd.f32 %v739_v55, %v654_v52 }
 0x2e8   :  { %v776_v62 = vadd.f32 %v2321_v19, %v740_v58 }
 0x2ea   :  { %v792_v2 = vmax.f32 %v776_v62, 0.0  ;;  %v674_v58 = vpop.f32.mrf.mxu3 }
 0x2ed   :  { %v741_v61 = vpop.f32.mrf.mxu0 }
 0x2ee   :  { %v742_v63 = vadd.f32 %v741_v61, %v656_v60 }
 0x2f0   :  { %v777_v1 = vadd.f32 %v2321_v19, %v742_v63 }
 0x2f2   :  { %v793_v3 = vmax.f32 %v777_v1, 0.0  ;;  %v676_v1 = vpop.f32.mrf.mxu3 }
 0x2f4   :  { %v2337_v4 = vpack.c.bf16 %v793_v3, %v792_v2 }
 0x2f5   :  { %v744_v16 = vpop.f32.mrf.mxu0 }
 0x2f6   :  { %1739 = vmatmul.msk.bf16.gmra.mxu1 %vm606_vm3, %v2337_v4  ;;  %v745_v17 = vadd.f32 %v744_v16, %v659_v46 }
 0x2f8   :  { %v778_v22 = vadd.f32 %v2321_v19, %v745_v17 }
 0x2fa   :  { %v794_v20 = vmax.f32 %v778_v22, 0.0 }
 0x2fd   :  { %v746_v18 = vpop.f32.mrf.mxu0 }
 0x2fe   :  { %v747_v23 = vadd.f32 %v746_v18, %v661_v59 }
 0x300   :  { %v779_v24 = vadd.f32 %v2321_v19, %v747_v23  ;;  %v679_v23 = vpop.f32.mrf.mxu3 }
 0x302   :  { %v795_v28 = vmax.f32 %v779_v24, 0.0 }
 0x304   :  { %v807_v29 = vpack.c.bf16 %v795_v28, %v794_v20 }
 0x305   :  { %v749_v13 = vpop.f32.mrf.mxu0 }
 0x306   :  { %1740 = vmatmul.msk.bf16.gmra.mxu1 %vm606_vm3, %v807_v29  ;;  %v750_v15 = vadd.f32 %v749_v13, %v664_v9 }
 0x308   :  { %v780_v35 = vadd.f32 %v2321_v19, %v750_v15  ;;  %v681_v28 = vpop.f32.mrf.mxu3 }
 0x30a   :  { %v796_v41 = vmax.f32 %v780_v35, 0.0 }
 0x30d   :  { %v751_v12 = vpop.f32.mrf.mxu0 }
 0x30e   :  { %v752_v37 = vadd.f32 %v751_v12, %v666_v7 }
 0x310   :  { %v781_v38 = vadd.f32 %v2321_v19, %v752_v37 }
 0x312   :  { %v797_v42 = vmax.f32 %v781_v38, 0.0 }
 0x314   :  { %v808_v44 = vpack.c.bf16 %v797_v42, %v796_v41 }
 0x315   :  { %v754_v46 = vpop.f32.mrf.mxu0 }
 0x316   :  { %1741 = vmatmul.msk.bf16.gmra.mxu1 %vm606_vm3, %v808_v44  ;;  %v755_v50 = vadd.f32 %v754_v46, %v669_v31 }
 0x318   :  { %v782_v52 = vadd.f32 %v2321_v19, %v755_v50 }
 0x31a   :  { %v798_v60 = vmax.f32 %v782_v52, 0.0 }
 0x31d   :  { %v756_v51 = vpop.f32.mrf.mxu0 }
 0x31e   :  { %v757_v55 = vadd.f32 %v756_v51, %v671_v45  ;;  %v1107_v51 = vld [vmem:[%s2534_s13 + $0x8] sm:$0xf] }
 0x320   :  { %v783_v59 = vadd.f32 %v2321_v19, %v757_v55 }
 0x322   :  { %v799_v61 = vmax.f32 %v783_v59, 0.0 }
 0x324   :  { %v809_v62 = vpack.c.bf16 %v799_v61, %v798_v60 }
 0x325   :  { %v759_v63 = vpop.f32.mrf.mxu0 }
 0x326   :  { %1742 = vmatmul.msk.bf16.gmra.mxu1 %vm606_vm3, %v809_v62  ;;  %v760_v2 = vadd.f32 %v759_v63, %v674_v58 }
 0x328   :  { %v784_v16 = vadd.f32 %v2321_v19, %v760_v2 }
 0x32a   :  { %v800_v18 = vmax.f32 %v784_v16, 0.0 }
 0x32d   :  { %v761_v3 = vpop.f32.mrf.mxu0 }
 0x32e   :  { %v762_v9 = vadd.f32 %v761_v3, %v676_v1 }
 0x330   :  { %v785_v17 = vadd.f32 %v2321_v19, %v762_v9 }
 0x332   :  { %v801_v22 = vmax.f32 %v785_v17, 0.0 }
 0x334   :  { %v810_v24 = vpack.c.bf16 %v801_v22, %v800_v18 }
 0x335   :  { %v764_v7 = vpop.f32.mrf.mxu0 }
 0x336   :  { %1743 = vmatmul.msk.bf16.gmra.mxu1 %vm606_vm3, %v810_v24  ;;  %v765_v20 = vadd.f32 %v764_v7, %v679_v23 }
 0x338   :  { %v786_v15 = vadd.f32 %v2321_v19, %v765_v20 }
 0x33a   :  { %v802_v35 = vmax.f32 %v786_v15, 0.0  ;;  %v2408_v15 = vld [vmem:[%s2533_s12] ss:$0 sm:$0xff] }
 0x33d   :  { %v766_v13 = vpop.f32.mrf.mxu0 }
 0x33e   :  { %v767_v31 = vadd.f32 %v766_v13, %v681_v28 }
 0x340   :  { %v787_v12 = vadd.f32 %v2321_v19, %v767_v31  ;;  %v814_v19 = vld [vmem:[%s2532_s10 + $0x8] sm:$0xf] }
 0x342   :  { %v803_v37 = vmax.f32 %v787_v12, 0.0 }
 0x344   :  { %v811_v38 = vpack.c.bf16 %v803_v37, %v802_v35 }
 0x346   :  { %819 = vmatpush.bf16.msrb.mxu3 %v811_v38  ;;  %1744 = vmatmul.msk.bf16.gmra.mxu1 %vm606_vm3, %v811_v38 }
 0x34a   :  { %820 = vmatpush.bf16.msrb.mxu3 %v810_v24 }
 0x34e   :  { %821 = vmatpush.bf16.msrb.mxu3 %v809_v62 }
 0x352   :  { %822 = vmatpush.bf16.msrb.mxu3 %v808_v44 }
 0x353   :  { %v937_v22 = vpop.f32.mrf.mxu1 }
 0x356   :  { %823 = vmatpush.bf16.msrb.mxu3 %v807_v29 }
 0x35a   :  { %824 = vmatpush.bf16.msrb.mxu3 %v2337_v4 }
 0x35b   :  { %v939_v20 = vpop.f32.mrf.mxu1 }
 0x35e   :  { %825 = vmatpush.bf16.msrb.mxu3 %v2331_v53  ;;  %v982_v53 = vunpack.c.l.b16 %v814_v19 }
 0x362   :  { %826 = vmatpush.bf16.msrb.mxu3 %v2325_v34  ;;  %v984_v34 = vpack.c.b16 %v982_v53, %v982_v53 }
 0x365   :  { %827 = vmatmul.bf16.vlgmr.msrb.gmra.mxu3 %v2188_v25  ;;  %v1011_v25 = vsel %vm631_vm2, %v984_v34, 0 }
 0x366   :  { %1019 = vmatpush.bf16.msra.mxu2 %v1011_v25 }
 0x375   :  { %832 = vmatmul.bf16.gmra.mxu3 %v2200_v30  ;;  %v1813_v30 = vld [vmem:[%s2532_s10] sm:$0xff] }
 0x376   :  { %1020 = vmatpush.bf16.msra.mxu2 %v1813_v30 }
 0x385   :  { %837 = vmatmul.bf16.gmra.mxu3 %v2212_v36 }
 0x395   :  { %842 = vmatmul.bf16.gmra.mxu3 %v2221_v43 }
 0x3a5   :  { %847 = vmatmul.bf16.gmra.mxu3 %v2227_v49 }
 0x3b5   :  { %852 = vmatmul.bf16.gmra.mxu3 %v2230_v54 }
 0x3c5   :  { %857 = vmatmul.bf16.gmra.mxu3 %v2240_v0 }
 0x3d5   :  { %862 = vmatmul.bf16.gmra.mxu3 %v2246_v6 }
 0x3e8   :  { %v828_v36 = vpop.f32.mrf.mxu3 }
 0x3e9   :  { %v868_v49 = vmul.f32 %v828_v36, %v2251_v10 }
 0x3f0   :  { %v830_v43 = vpop.f32.mrf.mxu3 }
 0x3f1   :  { %v869_v54 = vmul.f32 %v830_v43, %v2253_v14 }
 0x3f3   :  { %v884_v0 = vpack.c.bf16 %v869_v54, %v868_v49 }
 0x3f5   :  { %1749 = vmatmul.msk.bf16.vlgmr.msra.gmra.mxu2 %vm606_vm3, %v884_v0 }
 0x3f8   :  { %v833_v4 = vpop.f32.mrf.mxu3 }
 0x3f9   :  { %v870_v41 = vmul.f32 %v833_v4, %v2260_v21  ;;  %v1117_v21 = vunpack.c.l.b16 %v1107_v51 }
 0x3fb   :  { %v1119_v52 = vpack.c.b16 %v1117_v21, %v1117_v21  ;;  %v1223_v21 = vld [vmem:[%s2536_s15 + $0x8] sm:$0xf] }
 0x400   :  { %v835_v29 = vpop.f32.mrf.mxu3 }
 0x401   :  { %v871_v42 = vmul.f32 %v835_v29, %v2262_v8  ;;  %v1146_v8 = vsel %vm631_vm2, %v1119_v52, 0 }
 0x402   :  { %1154 = vmatpush.bf16.msra.mxu0 %v1146_v8  ;;  %v1233_v8 = vunpack.c.l.b16 %v1223_v21 }
 0x403   :  { %v885_v44 = vpack.c.bf16 %v871_v42, %v870_v41 }
 0x405   :  { %1750 = vmatmul.msk.bf16.gmra.mxu2 %vm606_vm3, %v885_v44 }
 0x408   :  { %v838_v45 = vpop.f32.mrf.mxu3 }
 0x409   :  { %v872_v46 = vmul.f32 %v838_v45, %v2269_v26 }
 0x410   :  { %v840_v6 = vpop.f32.mrf.mxu3 }
 0x411   :  { %v873_v10 = vmul.f32 %v840_v6, %v2271_v27 }
 0x413   :  { %v886_v50 = vpack.c.bf16 %v873_v10, %v872_v46 }
 0x415   :  { %1751 = vmatmul.msk.bf16.gmra.mxu2 %vm606_vm3, %v886_v50 }
 0x418   :  { %v843_v14 = vpop.f32.mrf.mxu3 }
 0x419   :  { %v874_v58 = vmul.f32 %v843_v14, %v2276_v32 }
 0x420   :  { %v845_v55 = vpop.f32.mrf.mxu3 }
 0x421   :  { %v875_v26 = vmul.f32 %v845_v55, %v2278_v33 }
 0x423   :  { %v887_v59 = vpack.c.bf16 %v875_v26, %v874_v58  ;;  %v1235_v58 = vpack.c.b16 %v1233_v8, %v1233_v8 }
 0x425   :  { %1752 = vmatmul.msk.bf16.gmra.mxu2 %vm606_vm3, %v887_v59  ;;  %v1262_v26 = vsel %vm631_vm2, %v1235_v58, 0 }
 0x426   :  { %1270 = vmatpush.bf16.msra.mxu3 %v1262_v26 }
 0x428   :  { %v848_v27 = vpop.f32.mrf.mxu3 }
 0x429   :  { %v876_v61 = vmul.f32 %v848_v27, %v2285_v40 }
 0x430   :  { %v850_v60 = vpop.f32.mrf.mxu3 }
 0x431   :  { %v877_v62 = vmul.f32 %v850_v60, %v2283_v39 }
 0x433   :  { %v888_v63 = vpack.c.bf16 %v877_v62, %v876_v61 }
 0x435   :  { %1753 = vmatmul.msk.bf16.gmra.mxu2 %vm606_vm3, %v888_v63 }
 0x438   :  { %v853_v1 = vpop.f32.mrf.mxu3 }
 0x439   :  { %v878_v3 = vmul.f32 %v853_v1, %v2290_v47  ;;  %v1815_v47 = vld [vmem:[%s2534_s13] sm:$0xff] }
 0x43a   :  { %1155 = vmatpush.bf16.msra.mxu0 %v1815_v47 }
 0x440   :  { %v855_v2 = vpop.f32.mrf.mxu3 }
 0x441   :  { %v879_v32 = vmul.f32 %v855_v2, %v2292_v48 }
 0x443   :  { %v889_v16 = vpack.c.bf16 %v879_v32, %v878_v3 }
 0x445   :  { %1754 = vmatmul.msk.bf16.gmra.mxu2 %vm606_vm3, %v889_v16 }
 0x448   :  { %v858_v33 = vpop.f32.mrf.mxu3 }
 0x449   :  { %v880_v17 = vmul.f32 %v858_v33, %v2297_v56  ;;  %v942_v56 = vpop.f32.mrf.mxu1 }
 0x450   :  { %v860_v9 = vpop.f32.mrf.mxu3 }
 0x451   :  { %v881_v40 = vmul.f32 %v860_v9, %v2299_v57  ;;  %v944_v57 = vpop.f32.mrf.mxu1 }
 0x453   :  { %v890_v18 = vpack.c.bf16 %v881_v40, %v880_v17 }
 0x455   :  { %1755 = vmatmul.msk.bf16.gmra.mxu2 %vm606_vm3, %v890_v18 }
 0x458   :  { %v863_v39 = vpop.f32.mrf.mxu3 }
 0x459   :  { %v882_v23 = vmul.f32 %v863_v39, %v2313_v11  ;;  %v947_v11 = vpop.f32.mrf.mxu1 }
 0x460   :  { %v865_v48 = vpop.f32.mrf.mxu3 }
 0x461   :  { %v883_v24 = vmul.f32 %v865_v48, %v2311_v5  ;;  %v949_v34 = vpop.f32.mrf.mxu1 }
 0x463   :  { %v891_v7 = vpack.c.bf16 %v883_v24, %v882_v23 }
 0x465   :  { %1756 = vmatmul.msk.bf16.gmra.mxu2 %vm606_vm3, %v891_v7 }
 0x469   :  { %v952_v4 = vpop.f32.mrf.mxu1 }
 0x471   :  { %v954_v44 = vpop.f32.mrf.mxu1 }
 0x478   :  { %v1022_v28 = vpop.f32.mrf.mxu2 }
 0x479   :  { %v1023_v13 = vadd.f32 %v1022_v28, %v937_v22  ;;  %v957_v55 = vpop.f32.mrf.mxu1 }
 0x47b   :  { %v1065_v12 = vadd.f32 %v2408_v15, %v1023_v13 }
 0x47d   :  { %v1081_v37 = vmax.f32 %v1065_v12, 0.0 }
 0x480   :  { %v1024_v31 = vpop.f32.mrf.mxu2 }
 0x481   :  { %v1025_v35 = vadd.f32 %v1024_v31, %v939_v20  ;;  %v959_v63 = vpop.f32.mrf.mxu1 }
 0x483   :  { %v1066_v5 = vadd.f32 %v2408_v15, %v1025_v35 }
 0x485   :  { %v1082_v38 = vmax.f32 %v1066_v5, 0.0 }
 0x487   :  { %v1097_v19 = vpack.c.bf16 %v1082_v38, %v1081_v37 }
 0x488   :  { %v1027_v53 = vpop.f32.mrf.mxu2 }
 0x489   :  { %1761 = vmatmul.msk.bf16.vlgmr.msra.gmra.mxu0 %vm606_vm3, %v1097_v19  ;;  %v1028_v25 = vadd.f32 %v1027_v53, %v942_v56  ;;  %v962_v33 = vpop.f32.mrf.mxu1 }
 0x48b   :  { %v1067_v36 = vadd.f32 %v2408_v15, %v1028_v25 }
 0x48d   :  { %v1083_v54 = vmax.f32 %v1067_v36, 0.0 }
 0x490   :  { %v1029_v30 = vpop.f32.mrf.mxu2 }
 0x491   :  { %v1030_v43 = vadd.f32 %v1029_v30, %v944_v57  ;;  %v964_v48 = vpop.f32.mrf.mxu1 }
 0x493   :  { %v1068_v49 = vadd.f32 %v2408_v15, %v1030_v43 }
 0x495   :  { %v1084_v0 = vmax.f32 %v1068_v49, 0.0  ;;  %v1816_v49 = vld [vmem:[%s2536_s15] sm:$0xff] }
 0x496   :  { %1271 = vmatpush.bf16.msra.mxu3 %v1816_v49 }
 0x497   :  { %v1098_v29 = vpack.c.bf16 %v1084_v0, %v1083_v54 }
 0x498   :  { %v1032_v41 = vpop.f32.mrf.mxu2 }
 0x499   :  { %1762 = vmatmul.msk.bf16.gmra.mxu0 %vm606_vm3, %v1098_v29  ;;  %v1033_v42 = vadd.f32 %v1032_v41, %v947_v11  ;;  %v967_v57 = vpop.f32.mrf.mxu1 }
 0x49b   :  { %v1069_v6 = vadd.f32 %v2408_v15, %v1033_v42 }
 0x49d   :  { %v1085_v50 = vmax.f32 %v1069_v6, 0.0 }
 0x4a0   :  { %v1034_v45 = vpop.f32.mrf.mxu2 }
 0x4a1   :  { %v1035_v46 = vadd.f32 %v1034_v45, %v949_v34  ;;  %v969_v11 = vpop.f32.mrf.mxu1 }
 0x4a3   :  { %v1070_v10 = vadd.f32 %v2408_v15, %v1035_v46 }
 0x4a5   :  { %v1086_v14 = vmax.f32 %v1070_v10, 0.0  ;;  %v1868_v10 = vld [vmem:[%s2535_s14] ss:$0 sm:$0xff] }
 0x4a7   :  { %v1099_v51 = vpack.c.bf16 %v1086_v14, %v1085_v50 }
 0x4a8   :  { %v1037_v52 = vpop.f32.mrf.mxu2 }
 0x4a9   :  { %1763 = vmatmul.msk.bf16.gmra.mxu0 %vm606_vm3, %v1099_v51  ;;  %v1038_v59 = vadd.f32 %v1037_v52, %v952_v4  ;;  %v972_v30 = vpop.f32.mrf.mxu1 }
 0x4ab   :  { %v1071_v60 = vadd.f32 %v2408_v15, %v1038_v59 }
 0x4ad   :  { %v1087_v1 = vmax.f32 %v1071_v60, 0.0 }
 0x4b0   :  { %v1039_v27 = vpop.f32.mrf.mxu2 }
 0x4b1   :  { %v1040_v61 = vadd.f32 %v1039_v27, %v954_v44  ;;  %v974_v0 = vpop.f32.mrf.mxu1 }
 0x4b3   :  { %v1072_v62 = vadd.f32 %v2408_v15, %v1040_v61 }
 0x4b5   :  { %v1088_v2 = vmax.f32 %v1072_v62, 0.0 }
 0x4b7   :  { %v1100_v3 = vpack.c.bf16 %v1088_v2, %v1087_v1 }
 0x4b8   :  { %v1042_v32 = vpop.f32.mrf.mxu2 }
 0x4b9   :  { %1764 = vmatmul.msk.bf16.gmra.mxu0 %vm606_vm3, %v1100_v3  ;;  %v1043_v16 = vadd.f32 %v1042_v32, %v957_v55 }
 0x4bb   :  { %v1073_v17 = vadd.f32 %v2408_v15, %v1043_v16 }
 0x4bd   :  { %v1089_v39 = vmax.f32 %v1073_v17, 0.0 }
 0x4c0   :  { %v1044_v9 = vpop.f32.mrf.mxu2 }
 0x4c1   :  { %v1045_v40 = vadd.f32 %v1044_v9, %v959_v63 }
 0x4c3   :  { %v1074_v18 = vadd.f32 %v2408_v15, %v1045_v40 }
 0x4c5   :  { %v1090_v22 = vmax.f32 %v1074_v18, 0.0 }
 0x4c7   :  { %v1101_v47 = vpack.c.bf16 %v1090_v22, %v1089_v39 }
 0x4c8   :  { %v1047_v23 = vpop.f32.mrf.mxu2 }
 0x4c9   :  { %1765 = vmatmul.msk.bf16.gmra.mxu0 %vm606_vm3, %v1101_v47  ;;  %v1048_v24 = vadd.f32 %v1047_v23, %v962_v33 }
 0x4cb   :  { %v1075_v20 = vadd.f32 %v2408_v15, %v1048_v24 }
 0x4cd   :  { %v1091_v13 = vmax.f32 %v1075_v20, 0.0 }
 0x4d0   :  { %v1049_v7 = vpop.f32.mrf.mxu2 }
 0x4d1   :  { %v1050_v56 = vadd.f32 %v1049_v7, %v964_v48 }
 0x4d3   :  { %v1076_v28 = vadd.f32 %v2408_v15, %v1050_v56 }
 0x4d5   :  { %v1092_v31 = vmax.f32 %v1076_v28, 0.0 }
 0x4d7   :  { %v1102_v12 = vpack.c.bf16 %v1092_v31, %v1091_v13 }
 0x4d8   :  { %v1052_v35 = vpop.f32.mrf.mxu2 }
 0x4d9   :  { %1766 = vmatmul.msk.bf16.gmra.mxu0 %vm606_vm3, %v1102_v12  ;;  %v1053_v5 = vadd.f32 %v1052_v35, %v967_v57 }
 0x4db   :  { %v1077_v38 = vadd.f32 %v2408_v15, %v1053_v5 }
 0x4dd   :  { %v1093_v34 = vmax.f32 %v1077_v38, 0.0 }
 0x4e0   :  { %v1054_v37 = vpop.f32.mrf.mxu2 }
 0x4e1   :  { %v1055_v19 = vadd.f32 %v1054_v37, %v969_v11 }
 0x4e3   :  { %v1078_v53 = vadd.f32 %v2408_v15, %v1055_v19 }
 0x4e5   :  { %v1094_v25 = vmax.f32 %v1078_v53, 0.0 }
 0x4e7   :  { %v1103_v36 = vpack.c.bf16 %v1094_v25, %v1093_v34 }
 0x4e8   :  { %v1057_v43 = vpop.f32.mrf.mxu2 }
 0x4e9   :  { %1767 = vmatmul.msk.bf16.gmra.mxu0 %vm606_vm3, %v1103_v36  ;;  %v1058_v54 = vadd.f32 %v1057_v43, %v972_v30 }
 0x4eb   :  { %v1079_v29 = vadd.f32 %v2408_v15, %v1058_v54 }
 0x4ed   :  { %v1095_v44 = vmax.f32 %v1079_v29, 0.0 }
 0x4f0   :  { %v1059_v4 = vpop.f32.mrf.mxu2 }
 0x4f1   :  { %v1060_v41 = vadd.f32 %v1059_v4, %v974_v0  ;;  %v2455_v4 = vld [vmem:[%s2537_s16] ss:$0 sm:$0xff] }
 0x4f3   :  { %v1080_v42 = vadd.f32 %v2408_v15, %v1060_v41 }
 0x4f5   :  { %v1096_v45 = vmax.f32 %v1080_v42, 0.0 }
 0x4f7   :  { %v1104_v6 = vpack.c.bf16 %v1096_v45, %v1095_v44 }
 0x4f9   :  { %1768 = vmatmul.msk.bf16.gmra.mxu0 %vm606_vm3, %v1104_v6 }
 0x506   :  { %v1157_v46 = vpop.f32.mrf.mxu0 }
 0x507   :  { %v1158_v50 = vadd.f32 %v1868_v10, %v1157_v46 }
 0x509   :  { %v1197_v21 = vmax.f32 %v1158_v50, 0.0 }
 0x50e   :  { %v1159_v14 = vpop.f32.mrf.mxu0 }
 0x50f   :  { %v1160_v51 = vadd.f32 %v1868_v10, %v1159_v14 }
 0x511   :  { %v1198_v52 = vmax.f32 %v1160_v51, 0.0 }
 0x513   :  { %v1213_v8 = vpack.c.bf16 %v1198_v52, %v1197_v21 }
 0x515   :  { %1773 = vmatmul.msk.bf16.vlgmr.msra.gmra.mxu3 %vm606_vm3, %v1213_v8 }
 0x516   :  { %v1162_v55 = vpop.f32.mrf.mxu0 }
 0x517   :  { %v1163_v15 = vadd.f32 %v1868_v10, %v1162_v55 }
 0x519   :  { %v1199_v59 = vmax.f32 %v1163_v15, 0.0 }
 0x51e   :  { %v1164_v58 = vpop.f32.mrf.mxu0 }
 0x51f   :  { %v1165_v26 = vadd.f32 %v1868_v10, %v1164_v58 }
 0x521   :  { %v1200_v27 = vmax.f32 %v1165_v26, 0.0 }
 0x523   :  { %v1214_v60 = vpack.c.bf16 %v1200_v27, %v1199_v59 }
 0x525   :  { %1774 = vmatmul.msk.bf16.gmra.mxu3 %vm606_vm3, %v1214_v60 }
 0x526   :  { %v1167_v61 = vpop.f32.mrf.mxu0 }
 0x527   :  { %v1168_v62 = vadd.f32 %v1868_v10, %v1167_v61 }
 0x529   :  { %v1201_v2 = vmax.f32 %v1168_v62, 0.0 }
 0x52e   :  { %v1169_v63 = vpop.f32.mrf.mxu0 }
 0x52f   :  { %v1170_v1 = vadd.f32 %v1868_v10, %v1169_v63 }
 0x531   :  { %v1202_v3 = vmax.f32 %v1170_v1, 0.0 }
 0x533   :  { %v1215_v32 = vpack.c.bf16 %v1202_v3, %v1201_v2 }
 0x535   :  { %1775 = vmatmul.msk.bf16.gmra.mxu3 %vm606_vm3, %v1215_v32 }
 0x536   :  { %v1172_v16 = vpop.f32.mrf.mxu0 }
 0x537   :  { %v1173_v33 = vadd.f32 %v1868_v10, %v1172_v16 }
 0x539   :  { %v1203_v40 = vmax.f32 %v1173_v33, 0.0 }
 0x53e   :  { %v1174_v9 = vpop.f32.mrf.mxu0 }
 0x53f   :  { %v1175_v17 = vadd.f32 %v1868_v10, %v1174_v9 }
 0x541   :  { %v1204_v18 = vmax.f32 %v1175_v17, 0.0 }
 0x543   :  { %v1216_v39 = vpack.c.bf16 %v1204_v18, %v1203_v40 }
 0x545   :  { %1776 = vmatmul.msk.bf16.gmra.mxu3 %vm606_vm3, %v1216_v39 }
 0x546   :  { %v1177_v22 = vpop.f32.mrf.mxu0 }
 0x547   :  { %v1178_v47 = vadd.f32 %v1868_v10, %v1177_v22 }
 0x549   :  { %v1205_v24 = vmax.f32 %v1178_v47, 0.0 }
 0x54e   :  { %v1179_v48 = vpop.f32.mrf.mxu0 }
 0x54f   :  { %v1180_v23 = vadd.f32 %v1868_v10, %v1179_v48 }
 0x551   :  { %v1206_v7 = vmax.f32 %v1180_v23, 0.0 }
 0x553   :  { %v1217_v20 = vpack.c.bf16 %v1206_v7, %v1205_v24 }
 0x555   :  { %1777 = vmatmul.msk.bf16.gmra.mxu3 %vm606_vm3, %v1217_v20 }
 0x556   :  { %v1182_v56 = vpop.f32.mrf.mxu0 }
 0x557   :  { %v1183_v57 = vadd.f32 %v1868_v10, %v1182_v56 }
 0x559   :  { %v1207_v31 = vmax.f32 %v1183_v57, 0.0 }
 0x55e   :  { %v1184_v28 = vpop.f32.mrf.mxu0 }
 0x55f   :  { %v1185_v13 = vadd.f32 %v1868_v10, %v1184_v28 }
 0x561   :  { %v1208_v12 = vmax.f32 %v1185_v13, 0.0 }
 0x563   :  { %v1218_v35 = vpack.c.bf16 %v1208_v12, %v1207_v31 }
 0x565   :  { %1778 = vmatmul.msk.bf16.gmra.mxu3 %vm606_vm3, %v1218_v35 }
 0x566   :  { %v1187_v11 = vpop.f32.mrf.mxu0 }
 0x567   :  { %v1188_v5 = vadd.f32 %v1868_v10, %v1187_v11 }
 0x569   :  { %v1209_v19 = vmax.f32 %v1188_v5, 0.0 }
 0x56e   :  { %v1189_v37 = vpop.f32.mrf.mxu0 }
 0x56f   :  { %v1190_v38 = vadd.f32 %v1868_v10, %v1189_v37 }
 0x571   :  { %v1210_v53 = vmax.f32 %v1190_v38, 0.0 }
 0x573   :  { %v1219_v34 = vpack.c.bf16 %v1210_v53, %v1209_v19 }
 0x575   :  { %1779 = vmatmul.msk.bf16.gmra.mxu3 %vm606_vm3, %v1219_v34 }
 0x576   :  { %v1192_v25 = vpop.f32.mrf.mxu0 }
 0x577   :  { %v1193_v30 = vadd.f32 %v1868_v10, %v1192_v25 }
 0x579   :  { %v1211_v49 = vmax.f32 %v1193_v30, 0.0 }
 0x57e   :  { %v1194_v36 = vpop.f32.mrf.mxu0 }
 0x57f   :  { %v1195_v43 = vadd.f32 %v1868_v10, %v1194_v36 }
 0x581   :  { %v1212_v54 = vmax.f32 %v1195_v43, 0.0 }
 0x583   :  { %v1220_v0 = vpack.c.bf16 %v1212_v54, %v1211_v49 }
 0x585   :  { %1780 = vmatmul.msk.bf16.gmra.mxu3 %vm606_vm3, %v1220_v0 }
 0x598   :  { %v1273_v29 = vpop.f32.mrf.mxu3 }
 0x599   :  { %v1274_v41 = vadd.f32 %v2455_v4, %v1273_v29 }
 0x59b   :  { %v1781_v42 = vmul.f32 -1.442695, %v1274_v41 }
 0x59d   :  { %1870 = vpow2.f32 %v1781_v42 }
 0x5a0   :  { %v1275_v44 = vpop.f32.mrf.mxu3 }
 0x5a1   :  { %v1276_v45 = vadd.f32 %v2455_v4, %v1275_v44 }
 0x5a3   :  { %v1871_v6 = vpop.eup %1870  ;;  %v1782_v46 = vmul.f32 -1.442695, %v1276_v45 }
 0x5a4   :  { %v1361_v10 = vadd.f32 1.0, %v1871_v6 }
 0x5a5   :  { %1872 = vpow2.f32 %v1782_v46 }
 0x5a6   :  { %1874 = vrcp.f32 %v1361_v10  ;;  %v1388_v58 = vand.u32 2147483648, %v1361_v10  ;;  %v1386_v27 = vand.u32 2147483647, %v1361_v10  ;;  %vm1382_vm5 = vweird.f32 %v1361_v10 }
 0x5a8   :  { %v1278_v50 = vpop.f32.mrf.mxu3  ;;  %v1389_v2 = vor.u32 1.1754944e-38, %v1388_v58  ;;  %vm1387_vm7 = vcmp.eq.f32.partialorder %v1386_v27, 8.507059e+37 }
 0x5a9   :  { %v1279_v14 = vadd.f32 %v2455_v4, %v1278_v50 }
 0x5ab   :  { %v1873_v51 = vpop.eup %1872  ;;  %v1783_v21 = vmul.f32 -1.442695, %v1279_v14 }
 0x5ac   :  { %v1875_v52 = vpop.eup %1874  ;;  %v1362_v8 = vadd.f32 1.0, %v1873_v51 }
 0x5ad   :  { %v1378_v55 = vmul.f32 %v1875_v52, %v1361_v10  ;;  %1876 = vpow2.f32 %v1783_v21  ;;  %vm1383_vm4 = vweird.f32 %v1875_v52 }
 0x5ae   :  { %1878 = vrcp.f32 %v1362_v8  ;;  %vm1384_vm6 = vmor %vm1382_vm5, %vm1383_vm4  ;;  %v1403_v17 = vand.u32 2147483648, %v1362_v8  ;;  %v1401_v39 = vand.u32 2147483647, %v1362_v8  ;;  %vm1397_vm9 = vweird.f32 %v1362_v8 }
 0x5af   :  { %v1379_v15 = vsub.f32 1.0, %v1378_v55 }
 0x5b0   :  { %v1280_v26 = vpop.f32.mrf.mxu3  ;;  %v1404_v7 = vor.u32 1.1754944e-38, %v1403_v17  ;;  %vm1402_vm11 = vcmp.eq.f32.partialorder %v1401_v39, 8.507059e+37 }
 0x5b1   :  { %v1380_v59 = vmul.f32 %v1875_v52, %v1379_v15  ;;  %v1281_v60 = vadd.f32 %v2455_v4, %v1280_v26 }
 0x5b3   :  { %v1877_v61 = vpop.eup %1876  ;;  %v1381_v62 = vadd.f32 %v1875_v52, %v1380_v59  ;;  %v1784_v63 = vmul.f32 -1.442695, %v1281_v60 }
 0x5b4   :  { %v1879_v1 = vpop.eup %1878  ;;  %v1363_v3 = vadd.f32 1.0, %v1877_v61 }
 0x5b5   :  { %v1385_v32 = vsel %vm1384_vm6, %v1875_v52, %v1381_v62  ;;  %v1393_v16 = vmul.f32 %v1879_v1, %v1362_v8  ;;  %1880 = vpow2.f32 %v1784_v63  ;;  %vm1398_vm8 = vweird.f32 %v1879_v1 }
 0x5b6   :  { %v1390_v33 = vsel %vm1387_vm7, %v1389_v2, %v1385_v32  ;;  %1882 = vrcp.f32 %v1363_v3  ;;  %vm1399_vm10 = vmor %vm1397_vm9, %vm1398_vm8  ;;  %v1418_v31 = vand.u32 2147483648, %v1363_v3  ;;  %v1416_v11 = vand.u32 2147483647, %v1363_v3 }
 0x5b7   :  { %1617 = vst [vmem:[%s2538_s17] sm:$0xff] %v1390_v33  ;;  %v1394_v9 = vsub.f32 1.0, %v1393_v16  ;;  %vm1412_vm13 = vweird.f32 %v1363_v3 }
 0x5b8   :  { %v1283_v40 = vpop.f32.mrf.mxu3  ;;  %v1419_v34 = vor.u32 1.1754944e-38, %v1418_v31  ;;  %vm1417_vm15 = vcmp.eq.f32.partialorder %v1416_v11, 8.507059e+37 }
 0x5b9   :  { %v1395_v18 = vmul.f32 %v1879_v1, %v1394_v9  ;;  %v1284_v22 = vadd.f32 %v2455_v4, %v1283_v40 }
 0x5bb   :  { %v1881_v47 = vpop.eup %1880  ;;  %v1396_v48 = vadd.f32 %v1879_v1, %v1395_v18  ;;  %v1785_v23 = vmul.f32 -1.442695, %v1284_v22 }
 0x5bc   :  { %v1883_v24 = vpop.eup %1882  ;;  %v1364_v20 = vadd.f32 1.0, %v1881_v47 }
 0x5bd   :  { %v1400_v56 = vsel %vm1399_vm10, %v1879_v1, %v1396_v48  ;;  %v1408_v57 = vmul.f32 %v1883_v24, %v1363_v3  ;;  %1884 = vpow2.f32 %v1785_v23  ;;  %vm1413_vm12 = vweird.f32 %v1883_v24 }
 0x5be   :  { %v1405_v28 = vsel %vm1402_vm11, %v1404_v7, %v1400_v56  ;;  %1886 = vrcp.f32 %v1364_v20  ;;  %vm1414_vm14 = vmor %vm1412_vm13, %vm1413_vm12  ;;  %v1433_v54 = vand.u32 2147483648, %v1364_v20  ;;  %v1431_v41 = vand.u32 2147483647, %v1364_v20 }
 0x5bf   :  { %1618 = vst [vmem:[%s2538_s17 + $0x8] sm:$0xff] %v1405_v28  ;;  %v1409_v13 = vsub.f32 1.0, %v1408_v57  ;;  %vm1427_vm1 = vweird.f32 %v1364_v20 }
 0x5c0   :  { %v1285_v12 = vpop.f32.mrf.mxu3  ;;  %v1434_v10 = vor.u32 1.1754944e-38, %v1433_v54  ;;  %vm1432_vm3 = vcmp.eq.f32.partialorder %v1431_v41, 8.507059e+37 }
 0x5c1   :  { %v1410_v35 = vmul.f32 %v1883_v24, %v1409_v13  ;;  %v1286_v5 = vadd.f32 %v2455_v4, %v1285_v12 }
 0x5c3   :  { %v1885_v37 = vpop.eup %1884  ;;  %v1411_v38 = vadd.f32 %v1883_v24, %v1410_v35  ;;  %v1786_v19 = vmul.f32 -1.442695, %v1286_v5 }
 0x5c4   :  { %v1887_v53 = vpop.eup %1886  ;;  %v1365_v25 = vadd.f32 1.0, %v1885_v37 }
 0x5c5   :  { %v1415_v30 = vsel %vm1414_vm14, %v1883_v24, %v1411_v38  ;;  %v1423_v36 = vmul.f32 %v1887_v53, %v1364_v20  ;;  %1888 = vpow2.f32 %v1786_v19  ;;  %vm1428_vm0 = vweird.f32 %v1887_v53 }
 0x5c6   :  { %v1420_v43 = vsel %vm1417_vm15, %v1419_v34, %v1415_v30  ;;  %1890 = vrcp.f32 %v1365_v25  ;;  %vm1429_vm2 = vmor %vm1427_vm1, %vm1428_vm0  ;;  %v1448_v8 = vand.u32 2147483648, %v1365_v25  ;;  %v1446_v58 = vand.u32 2147483647, %v1365_v25 }
 0x5c7   :  { %1619 = vst [vmem:[%s2538_s17 + $0x10] sm:$0xff] %v1420_v43  ;;  %v1424_v49 = vsub.f32 1.0, %v1423_v36  ;;  %vm1442_vm5 = vweird.f32 %v1365_v25 }
 0x5c8   :  { %v1288_v0 = vpop.f32.mrf.mxu3  ;;  %v1449_v62 = vor.u32 1.1754944e-38, %v1448_v8  ;;  %vm1447_vm7 = vcmp.eq.f32.partialorder %v1446_v58, 8.507059e+37 }
 0x5c9   :  { %v1425_v29 = vmul.f32 %v1887_v53, %v1424_v49  ;;  %v1289_v42 = vadd.f32 %v2455_v4, %v1288_v0 }
 0x5cb   :  { %v1889_v44 = vpop.eup %1888  ;;  %v1426_v45 = vadd.f32 %v1887_v53, %v1425_v29  ;;  %v1787_v6 = vmul.f32 -1.442695, %v1289_v42 }
 0x5cc   :  { %v1891_v46 = vpop.eup %1890  ;;  %v1366_v50 = vadd.f32 1.0, %v1889_v44 }
 0x5cd   :  { %v1430_v14 = vsel %vm1429_vm2, %v1887_v53, %v1426_v45  ;;  %v1438_v51 = vmul.f32 %v1891_v46, %v1365_v25  ;;  %1892 = vpow2.f32 %v1787_v6  ;;  %vm1443_vm4 = vweird.f32 %v1891_v46 }
 0x5ce   :  { %v1435_v21 = vsel %vm1432_vm3, %v1434_v10, %v1430_v14  ;;  %1894 = vrcp.f32 %v1366_v50  ;;  %vm1444_vm6 = vmor %vm1442_vm5, %vm1443_vm4  ;;  %v1463_v16 = vand.u32 2147483648, %v1366_v50  ;;  %v1461_v17 = vand.u32 2147483647, %v1366_v50 }
 0x5cf   :  { %1620 = vst [vmem:[%s2538_s17 + $0x18] sm:$0xff] %v1435_v21  ;;  %v1439_v52 = vsub.f32 1.0, %v1438_v51  ;;  %vm1457_vm9 = vweird.f32 %v1366_v50 }
 0x5d0   :  { %v1290_v55 = vpop.f32.mrf.mxu3  ;;  %v1464_v48 = vor.u32 1.1754944e-38, %v1463_v16  ;;  %vm1462_vm11 = vcmp.eq.f32.partialorder %v1461_v17, 8.507059e+37 }
 0x5d1   :  { %v1440_v15 = vmul.f32 %v1891_v46, %v1439_v52  ;;  %v1291_v26 = vadd.f32 %v2455_v4, %v1290_v55 }
 0x5d3   :  { %v1893_v59 = vpop.eup %1892  ;;  %v1441_v27 = vadd.f32 %v1891_v46, %v1440_v15  ;;  %v1788_v60 = vmul.f32 -1.442695, %v1291_v26 }
 0x5d4   :  { %v1895_v61 = vpop.eup %1894  ;;  %v1367_v63 = vadd.f32 1.0, %v1893_v59 }
 0x5d5   :  { %v1445_v1 = vsel %vm1444_vm6, %v1891_v46, %v1441_v27  ;;  %v1453_v2 = vmul.f32 %v1895_v61, %v1366_v50  ;;  %1896 = vpow2.f32 %v1788_v60  ;;  %vm1458_vm8 = vweird.f32 %v1895_v61 }
 0x5d6   :  { %v1450_v3 = vsel %vm1447_vm7, %v1449_v62, %v1445_v1  ;;  %1898 = vrcp.f32 %v1367_v63  ;;  %vm1459_vm10 = vmor %vm1457_vm9, %vm1458_vm8  ;;  %v1478_v57 = vand.u32 2147483648, %v1367_v63  ;;  %v1476_v31 = vand.u32 2147483647, %v1367_v63 }
 0x5d7   :  { %1621 = vst [vmem:[%s2538_s17 + $0x20] sm:$0xff] %v1450_v3  ;;  %v1454_v32 = vsub.f32 1.0, %v1453_v2  ;;  %vm1472_vm13 = vweird.f32 %v1367_v63 }
 0x5d8   :  { %v1293_v33 = vpop.f32.mrf.mxu3  ;;  %v1479_v38 = vor.u32 1.1754944e-38, %v1478_v57  ;;  %vm1477_vm15 = vcmp.eq.f32.partialorder %v1476_v31, 8.507059e+37 }
 0x5d9   :  { %v1455_v9 = vmul.f32 %v1895_v61, %v1454_v32  ;;  %v1294_v40 = vadd.f32 %v2455_v4, %v1293_v33 }
 0x5db   :  { %v1897_v18 = vpop.eup %1896  ;;  %v1456_v39 = vadd.f32 %v1895_v61, %v1455_v9  ;;  %v1789_v22 = vmul.f32 -1.442695, %v1294_v40 }
 0x5dc   :  { %v1899_v47 = vpop.eup %1898  ;;  %v1368_v23 = vadd.f32 1.0, %v1897_v18 }
 0x5dd   :  { %v1460_v24 = vsel %vm1459_vm10, %v1895_v61, %v1456_v39  ;;  %v1468_v7 = vmul.f32 %v1899_v47, %v1367_v63  ;;  %1900 = vpow2.f32 %v1789_v22  ;;  %vm1473_vm12 = vweird.f32 %v1899_v47 }
 0x5de   :  { %v1465_v20 = vsel %vm1462_vm11, %v1464_v48, %v1460_v24  ;;  %1902 = vrcp.f32 %v1368_v23  ;;  %vm1474_vm14 = vmor %vm1472_vm13, %vm1473_vm12  ;;  %v1493_v36 = vand.u32 2147483648, %v1368_v23  ;;  %v1491_v54 = vand.u32 2147483647, %v1368_v23 }
 0x5df   :  { %1622 = vst [vmem:[%s2538_s17 + $0x28] sm:$0xff] %v1465_v20  ;;  %v1469_v56 = vsub.f32 1.0, %v1468_v7  ;;  %vm1487_vm1 = vweird.f32 %v1368_v23 }
 0x5e0   :  { %v1295_v28 = vpop.f32.mrf.mxu3  ;;  %v1494_v45 = vor.u32 1.1754944e-38, %v1493_v36  ;;  %vm1492_vm3 = vcmp.eq.f32.partialorder %v1491_v54, 8.507059e+37 }
 0x5e1   :  { %v1470_v13 = vmul.f32 %v1899_v47, %v1469_v56  ;;  %v1296_v12 = vadd.f32 %v2455_v4, %v1295_v28 }
 0x5e3   :  { %v1901_v35 = vpop.eup %1900  ;;  %v1471_v11 = vadd.f32 %v1899_v47, %v1470_v13  ;;  %v1790_v5 = vmul.f32 -1.442695, %v1296_v12 }
 0x5e4   :  { %v1903_v37 = vpop.eup %1902  ;;  %v1369_v19 = vadd.f32 1.0, %v1901_v35 }
 0x5e5   :  { %v1475_v53 = vsel %vm1474_vm14, %v1899_v47, %v1471_v11  ;;  %v1483_v34 = vmul.f32 %v1903_v37, %v1368_v23  ;;  %1904 = vpow2.f32 %v1790_v5  ;;  %vm1488_vm0 = vweird.f32 %v1903_v37 }
 0x5e6   :  { %v1480_v25 = vsel %vm1477_vm15, %v1479_v38, %v1475_v53  ;;  %1906 = vrcp.f32 %v1369_v19  ;;  %vm1489_vm2 = vmor %vm1487_vm1, %vm1488_vm0  ;;  %v1508_v51 = vand.u32 2147483648, %v1369_v19  ;;  %v1506_v8 = vand.u32 2147483647, %v1369_v19 }
 0x5e7   :  { %1623 = vst [vmem:[%s2538_s17 + $0x30] sm:$0xff] %v1480_v25  ;;  %v1484_v30 = vsub.f32 1.0, %v1483_v34  ;;  %vm1502_vm5 = vweird.f32 %v1369_v19 }
 0x5e8   :  { %v1298_v43 = vpop.f32.mrf.mxu3  ;;  %v1509_v27 = vor.u32 1.1754944e-38, %v1508_v51  ;;  %vm1507_vm7 = vcmp.eq.f32.partialorder %v1506_v8, 8.507059e+37 }
 0x5e9   :  { %v1485_v49 = vmul.f32 %v1903_v37, %v1484_v30  ;;  %v1299_v0 = vadd.f32 %v2455_v4, %v1298_v43 }
 0x5eb   :  { %v1905_v29 = vpop.eup %1904  ;;  %v1486_v41 = vadd.f32 %v1903_v37, %v1485_v49  ;;  %v1791_v42 = vmul.f32 -1.442695, %v1299_v0 }
 0x5ec   :  { %v1907_v44 = vpop.eup %1906  ;;  %v1370_v6 = vadd.f32 1.0, %v1905_v29 }
 0x5ed   :  { %v1490_v46 = vsel %vm1489_vm2, %v1903_v37, %v1486_v41  ;;  %v1498_v10 = vmul.f32 %v1907_v44, %v1369_v19  ;;  %1908 = vpow2.f32 %v1791_v42  ;;  %vm1503_vm4 = vweird.f32 %v1907_v44 }
 0x5ee   :  { %v1495_v50 = vsel %vm1492_vm3, %v1494_v45, %v1490_v46  ;;  %1910 = vrcp.f32 %v1370_v6  ;;  %vm1504_vm6 = vmor %vm1502_vm5, %vm1503_vm4  ;;  %v1523_v2 = vand.u32 2147483648, %v1370_v6  ;;  %v1521_v16 = vand.u32 2147483647, %v1370_v6 }
 0x5ef   :  { %1624 = vst [vmem:[%s2538_s17 + $0x38] sm:$0xff] %v1495_v50  ;;  %v1499_v14 = vsub.f32 1.0, %v1498_v10  ;;  %vm1517_vm9 = vweird.f32 %v1370_v6 }
 0x5f0   :  { %v1300_v21 = vpop.f32.mrf.mxu3  ;;  %v1524_v39 = vor.u32 1.1754944e-38, %v1523_v2  ;;  %vm1522_vm11 = vcmp.eq.f32.partialorder %v1521_v16, 8.507059e+37 }
 0x5f1   :  { %v1500_v52 = vmul.f32 %v1907_v44, %v1499_v14  ;;  %v1301_v55 = vadd.f32 %v2455_v4, %v1300_v21 }
 0x5f3   :  { %v1909_v15 = vpop.eup %1908  ;;  %v1501_v58 = vadd.f32 %v1907_v44, %v1500_v52  ;;  %v1792_v26 = vmul.f32 -1.442695, %v1301_v55 }
 0x5f4   :  { %v1911_v59 = vpop.eup %1910  ;;  %v1371_v60 = vadd.f32 1.0, %v1909_v15 }
 0x5f5   :  { %v1505_v61 = vsel %vm1504_vm6, %v1907_v44, %v1501_v58  ;;  %v1513_v62 = vmul.f32 %v1911_v59, %v1370_v6  ;;  %1912 = vpow2.f32 %v1792_v26  ;;  %vm1518_vm8 = vweird.f32 %v1911_v59 }
 0x5f6   :  { %v1510_v63 = vsel %vm1507_vm7, %v1509_v27, %v1505_v61  ;;  %1914 = vrcp.f32 %v1371_v60  ;;  %vm1519_vm10 = vmor %vm1517_vm9, %vm1518_vm8  ;;  %v1538_v7 = vand.u32 2147483648, %v1371_v60  ;;  %v1536_v57 = vand.u32 2147483647, %v1371_v60 }
 0x5f7   :  { %1625 = vst [vmem:[%s2538_s17 + $0x40] sm:$0xff] %v1510_v63  ;;  %v1514_v1 = vsub.f32 1.0, %v1513_v62  ;;  %vm1532_vm13 = vweird.f32 %v1371_v60 }
 0x5f8   :  { %v1303_v3 = vpop.f32.mrf.mxu3  ;;  %v1539_v11 = vor.u32 1.1754944e-38, %v1538_v7  ;;  %vm1537_vm15 = vcmp.eq.f32.partialorder %v1536_v57, 8.507059e+37 }
 0x5f9   :  { %v1515_v32 = vmul.f32 %v1911_v59, %v1514_v1  ;;  %v1304_v33 = vadd.f32 %v2455_v4, %v1303_v3 }
 0x5fb   :  { %v1913_v9 = vpop.eup %1912  ;;  %v1516_v17 = vadd.f32 %v1911_v59, %v1515_v32  ;;  %v1793_v40 = vmul.f32 -1.442695, %v1304_v33 }
 0x5fc   :  { %v1915_v18 = vpop.eup %1914  ;;  %v1372_v22 = vadd.f32 1.0, %v1913_v9 }
 0x5fd   :  { %v1520_v47 = vsel %vm1519_vm10, %v1911_v59, %v1516_v17  ;;  %v1528_v48 = vmul.f32 %v1915_v18, %v1371_v60  ;;  %1916 = vpow2.f32 %v1793_v40  ;;  %vm1533_vm12 = vweird.f32 %v1915_v18 }
 0x5fe   :  { %v1525_v23 = vsel %vm1522_vm11, %v1524_v39, %v1520_v47  ;;  %1918 = vrcp.f32 %v1372_v22  ;;  %vm1534_vm14 = vmor %vm1532_vm13, %vm1533_vm12  ;;  %v1553_v34 = vand.u32 2147483648, %v1372_v22  ;;  %v1551_v36 = vand.u32 2147483647, %v1372_v22 }
 0x5ff   :  { %1626 = vst [vmem:[%s2538_s17 + $0x48] sm:$0xff] %v1525_v23  ;;  %v1529_v24 = vsub.f32 1.0, %v1528_v48  ;;  %vm1547_vm1 = vweird.f32 %v1372_v22 }
 0x600   :  { %v1305_v20 = vpop.f32.mrf.mxu3  ;;  %v1554_v41 = vor.u32 1.1754944e-38, %v1553_v34  ;;  %vm1552_vm3 = vcmp.eq.f32.partialorder %v1551_v36, 8.507059e+37 }
 0x601   :  { %v1530_v56 = vmul.f32 %v1915_v18, %v1529_v24  ;;  %v1306_v28 = vadd.f32 %v2455_v4, %v1305_v20 }
 0x603   :  { %v1917_v13 = vpop.eup %1916  ;;  %v1531_v31 = vadd.f32 %v1915_v18, %v1530_v56  ;;  %v1794_v12 = vmul.f32 -1.442695, %v1306_v28 }
 0x604   :  { %v1919_v35 = vpop.eup %1918  ;;  %v1373_v5 = vadd.f32 1.0, %v1917_v13 }
 0x605   :  { %v1535_v37 = vsel %vm1534_vm14, %v1915_v18, %v1531_v31  ;;  %v1543_v38 = vmul.f32 %v1919_v35, %v1372_v22  ;;  %1920 = vpow2.f32 %v1794_v12  ;;  %vm1548_vm0 = vweird.f32 %v1919_v35 }
 0x606   :  { %v1540_v19 = vsel %vm1537_vm15, %v1539_v11, %v1535_v37  ;;  %1922 = vrcp.f32 %v1373_v5  ;;  %vm1549_vm2 = vmor %vm1547_vm1, %vm1548_vm0  ;;  %v1568_v10 = vand.u32 2147483648, %v1373_v5  ;;  %v1566_v51 = vand.u32 2147483647, %v1373_v5 }
 0x607   :  { %1627 = vst [vmem:[%s2538_s17 + $0x50] sm:$0xff] %v1540_v19  ;;  %v1544_v53 = vsub.f32 1.0, %v1543_v38  ;;  %vm1562_vm5 = vweird.f32 %v1373_v5 }
 0x608   :  { %v1308_v25 = vpop.f32.mrf.mxu3  ;;  %v1569_v58 = vor.u32 1.1754944e-38, %v1568_v10  ;;  %vm1567_vm7 = vcmp.eq.f32.partialorder %v1566_v51, 8.507059e+37 }
 0x609   :  { %v1545_v30 = vmul.f32 %v1919_v35, %v1544_v53  ;;  %v1309_v43 = vadd.f32 %v2455_v4, %v1308_v25 }
 0x60b   :  { %v1921_v49 = vpop.eup %1920  ;;  %v1546_v54 = vadd.f32 %v1919_v35, %v1545_v30  ;;  %v1795_v0 = vmul.f32 -1.442695, %v1309_v43 }
 0x60c   :  { %v1923_v29 = vpop.eup %1922  ;;  %v1374_v42 = vadd.f32 1.0, %v1921_v49 }
 0x60d   :  { %v1550_v44 = vsel %vm1549_vm2, %v1919_v35, %v1546_v54  ;;  %v1558_v45 = vmul.f32 %v1923_v29, %v1373_v5  ;;  %1924 = vpow2.f32 %v1795_v0  ;;  %vm1563_vm4 = vweird.f32 %v1923_v29 }
 0x60e   :  { %v1555_v6 = vsel %vm1552_vm3, %v1554_v41, %v1550_v44  ;;  %1926 = vrcp.f32 %v1374_v42  ;;  %vm1564_vm6 = vmor %vm1562_vm5, %vm1563_vm4  ;;  %v1581_v63 = vand.u32 2147483647, %v1374_v42  ;;  %vm1577_vm9 = vweird.f32 %v1374_v42 }
 0x60f   :  { %1628 = vst [vmem:[%s2538_s17 + $0x58] sm:$0xff] %v1555_v6  ;;  %v1559_v46 = vsub.f32 1.0, %v1558_v45 }
 0x610   :  { %v1310_v50 = vpop.f32.mrf.mxu3  ;;  %vm1582_vm11 = vcmp.eq.f32.partialorder %v1581_v63, 8.507059e+37 }
 0x611   :  { %v1560_v14 = vmul.f32 %v1923_v29, %v1559_v46  ;;  %v1311_v21 = vadd.f32 %v2455_v4, %v1310_v50  ;;  %v1583_v4 = vand.u32 2147483648, %v1374_v42 }
 0x613   :  { %v1925_v52 = vpop.eup %1924  ;;  %v1561_v8 = vadd.f32 %v1923_v29, %v1560_v14  ;;  %v1796_v55 = vmul.f32 -1.442695, %v1311_v21  ;;  %v1584_v32 = vor.u32 1.1754944e-38, %v1583_v4 }
 0x614   :  { %v1927_v15 = vpop.eup %1926  ;;  %v1375_v26 = vadd.f32 1.0, %v1925_v52 }
 0x615   :  { %v1565_v59 = vsel %vm1564_vm6, %v1923_v29, %v1561_v8  ;;  %v1573_v27 = vmul.f32 %v1927_v15, %v1374_v42  ;;  %1928 = vpow2.f32 %v1796_v55  ;;  %vm1578_vm8 = vweird.f32 %v1927_v15 }
 0x616   :  { %v1570_v60 = vsel %vm1567_vm7, %v1569_v58, %v1565_v59  ;;  %1930 = vrcp.f32 %v1375_v26  ;;  %vm1579_vm10 = vmor %vm1577_vm9, %vm1578_vm8  ;;  %v1598_v18 = vand.u32 2147483648, %v1375_v26  ;;  %v1596_v22 = vand.u32 2147483647, %v1375_v26 }
 0x617   :  { %1629 = vst [vmem:[%s2538_s17 + $0x60] sm:$0xff] %v1570_v60  ;;  %v1574_v61 = vsub.f32 1.0, %v1573_v27  ;;  %vm1592_vm13 = vweird.f32 %v1375_v26 }
 0x618   :  { %v1599_v23 = vor.u32 1.1754944e-38, %v1598_v18  ;;  %vm1597_vm15 = vcmp.eq.f32.partialorder %v1596_v22, 8.507059e+37 }
 0x619   :  { %v1575_v62 = vmul.f32 %v1927_v15, %v1574_v61 }
 0x61b   :  { %v1929_v1 = vpop.eup %1928  ;;  %v1576_v2 = vadd.f32 %v1927_v15, %v1575_v62 }
 0x61c   :  { %v1931_v3 = vpop.eup %1930  ;;  %v1376_v16 = vadd.f32 1.0, %v1929_v1 }
 0x61d   :  { %v1580_v33 = vsel %vm1579_vm10, %v1927_v15, %v1576_v2  ;;  %v1588_v9 = vmul.f32 %v1931_v3, %v1375_v26  ;;  %vm1593_vm12 = vweird.f32 %v1931_v3 }
 0x61e   :  { %v1585_v17 = vsel %vm1582_vm11, %v1584_v32, %v1580_v33  ;;  %1932 = vrcp.f32 %v1376_v16  ;;  %vm1594_vm14 = vmor %vm1592_vm13, %vm1593_vm12  ;;  %v1613_v57 = vand.u32 2147483648, %v1376_v16  ;;  %v1611_v13 = vand.u32 2147483647, %v1376_v16 }
 0x61f   :  { %1630 = vst [vmem:[%s2538_s17 + $0x68] sm:$0xff] %v1585_v17  ;;  %v1589_v40 = vsub.f32 1.0, %v1588_v9  ;;  %vm1607_vm1 = vweird.f32 %v1376_v16 }
 0x620   :  { %v1614_v12 = vor.u32 1.1754944e-38, %v1613_v57  ;;  %vm1612_vm3 = vcmp.eq.f32.partialorder %v1611_v13, 8.507059e+37 }
 0x621   :  { %v1590_v39 = vmul.f32 %v1931_v3, %v1589_v40 }
 0x623   :  { %v1591_v47 = vadd.f32 %v1931_v3, %v1590_v39 }
 0x624   :  { %v1933_v48 = vpop.eup %1932 }
 0x625   :  { %v1595_v24 = vsel %vm1594_vm14, %v1931_v3, %v1591_v47  ;;  %v1603_v7 = vmul.f32 %v1933_v48, %v1376_v16  ;;  %vm1608_vm0 = vweird.f32 %v1933_v48 }
 0x626   :  { %v1600_v20 = vsel %vm1597_vm15, %v1599_v23, %v1595_v24  ;;  %vm1609_vm2 = vmor %vm1607_vm1, %vm1608_vm0 }
 0x627   :  { %1631 = vst [vmem:[%s2538_s17 + $0x70] sm:$0xff] %v1600_v20  ;;  %v1604_v56 = vsub.f32 1.0, %v1603_v7 }
 0x629   :  { %v1605_v28 = vmul.f32 %v1933_v48, %v1604_v56 }
 0x62b   :  { %v1606_v31 = vadd.f32 %v1933_v48, %v1605_v28 }
 0x62d   :  { %v1610_v35 = vsel %vm1609_vm2, %v1933_v48, %v1606_v31 }
 0x62e   :  { %v1615_v11 = vsel %vm1612_vm3, %v1614_v12, %v1610_v35 }
 0x62f   :  { %1632 = vst [vmem:[%s2538_s17 + $0x78] sm:$0xff] %v1615_v11 }

</bundles_post_ra>
